<compile_context>
chip_gen: v7x
topology: tpu7x:2x2x1
jax: 0.10.0
libtpu: 0.0.40
codegen_flags: <defaults>
</compile_context>

<pallas_src>
import jax
import jax.numpy as jnp
from jax.experimental import pallas as pl
from jax.experimental.pallas import tpu as pltpu


def _fused_scale_conv1x1_kernel(s_ref, w_ref, x_ref, o_ref):
    # s_ref: (1, C_in)     f32  per-channel SE scale (VMEM-resident, tiny)
    # w_ref: (C_out, C_in) f32  1x1 conv weight      (VMEM-resident, tiny)
    # x_ref: (C_in, tm)    f32  one pixel tile, channels-first (NCHW-native)
    # o_ref: (C_out, tm)        one output pixel tile
    # Fold the SE scale into the tiny weight:  sum_c (w[o,c]*s[c]) * x[c,m].
    # Keep everything f32; HIGHEST precision is free because the kernel is
    # HBM-bandwidth bound (C_out=40 uses <1/3 of the MXU rows anyway).
    w_scaled = w_ref[...] * s_ref[...]
    o_ref[...] = jnp.dot(
        w_scaled,
        x_ref[...],
        preferred_element_type=jnp.float32,
        precision=jax.lax.Precision.HIGHEST,
    ).astype(o_ref.dtype)


def fused_mul_conv1x1(x_nchw, scale_nc11, weight_oi11, *, tm=1024):
    """Equivalent of: Conv2d(C_in, C_out, 1, stride=1, bias=False)(x * scale).

    x_nchw:      (1, C_in, H, W)
    scale_nc11:  (1, C_in, 1, 1)
    weight_oi11: (C_out, C_in, 1, 1)
    returns:     (1, C_out, H, W)
    """
    N, C_in, H, W = x_nchw.shape
    C_out = weight_oi11.shape[0]
    assert N == 1, "SE scale broadcast assumed over a single batch element"
    # TODO(synk): batched (N>1) inputs would need the batch folded into the
    # pixel axis or an extra grid dimension.
    M = H * W

    # Pure reshapes (no copies): NCHW with N=1 is already (C_in, M);
    # the (C_out, M) result is already NCHW.
    x_mat = x_nchw.reshape(C_in, M)
    s_row = scale_nc11.reshape(1, C_in)
    w_mat = weight_oi11.reshape(C_out, C_in)

    # Pixel-tile size: lane dim must be a multiple of 128 or the full extent.
    # Cap at 2048 so double-buffered f32 tiles stay under v5e's 16 MiB scoped
    # VMEM default; larger tiles buy nothing once DMA bursts are long enough.
    tm = min(tm, 2048)
    if tm >= M:
        tm = M  # single full-extent block
    else:
        tm = max(128, (tm // 128) * 128)
    grid = (pl.cdiv(M, tm),)

    cost = pl.CostEstimate(
        flops=2 * C_out * C_in * M,
        bytes_accessed=4 * (C_in * M + C_out * M + C_out * C_in + C_in),
        transcendentals=0,
    )

    out_mat = pl.pallas_call(
        _fused_scale_conv1x1_kernel,
        out_shape=jax.ShapeDtypeStruct((C_out, M), x_nchw.dtype),
        grid=grid,
        in_specs=[
            pl.BlockSpec((1, C_in), lambda i: (0, 0)),       # SE scale: resident
            pl.BlockSpec((C_out, C_in), lambda i: (0, 0)),   # weight:   resident
            pl.BlockSpec((C_in, tm), lambda i: (0, i)),      # X pixel tile
        ],
        out_specs=pl.BlockSpec((C_out, tm), lambda i: (0, i)),
        compiler_params=pltpu.CompilerParams(
            dimension_semantics=("parallel",),  # pipelining + v7x megacore sharding
        ),
        cost_estimate=cost,
    )(s_row, w_mat, x_mat)

    return out_mat.reshape(N, C_out, H, W)


def _ref_f32(x_nchw, scale_nc11, weight_oi11):
    C_out = weight_oi11.shape[0]
    return jnp.einsum(
        "nchw,oc->nohw",
        x_nchw * scale_nc11,
        weight_oi11.reshape(C_out, -1),
    )


if __name__ == "__main__":
    # Channel dims are fixed by the module (240 -> 40); small spatial sizes
    # for the demo (the real module uses 56x56 -> M=3136).
    N, C_in, C_out = 1, 240, 40

    key = jax.random.PRNGKey(0)
    kx, ks, kw, kx2 = jax.random.split(key, 4)

    # Case 1: M = 16*16 = 256 (multiple of 128) -> single full-extent tile.
    H, W = 16, 16
    x91 = jax.random.normal(kx, (N, C_in, H, W), dtype=jnp.float32)
    x96 = jax.random.normal(ks, (N, C_in, 1, 1), dtype=jnp.float32)
    weight = jax.random.normal(kw, (C_out, C_in, 1, 1), dtype=jnp.float32) * 0.05

    out = fused_mul_conv1x1(x91, x96, weight)
    jax.block_until_ready(out)
    assert out.shape == (N, C_out, H, W)
    ref = _ref_f32(x91, x96, weight)
    assert jnp.allclose(out, ref, atol=1e-3, rtol=1e-3), float(
        jnp.max(jnp.abs(out - ref))
    )

    # Case 2: M = 14*14 = 196 (NOT a multiple of 128), tm=128 -> ragged last
    # block exercises the masked-store / partial-lane path.
    H2, W2 = 14, 14
    x91b = jax.random.normal(kx2, (N, C_in, H2, W2), dtype=jnp.float32)
    out2 = fused_mul_conv1x1(x91b, x96, weight, tm=128)
    jax.block_until_ready(out2)
    assert out2.shape == (N, C_out, H2, W2)
    ref2 = _ref_f32(x91b, x96, weight)
    assert jnp.allclose(out2, ref2, atol=1e-3, rtol=1e-3), float(
        jnp.max(jnp.abs(out2 - ref2))
    )

    print("KERNEL_OK")
</pallas_src>

<mosaic_0001>
module attributes {stable_mosaic.version = 11 : i64} {
  func.func @_fused_scale_conv1x1_kernel(%arg0: i32, %arg1: memref<1x240xf32, #tpu.memory_space<vmem>>, %arg2: memref<40x240xf32, #tpu.memory_space<vmem>>, %arg3: memref<240x256xf32, #tpu.memory_space<vmem>>, %arg4: memref<40x256xf32, #tpu.memory_space<vmem>>) attributes {dimension_semantics = [#tpu.dimension_semantics<parallel>], iteration_bounds = array<i64: 1>, scalar_prefetch = 0 : i64, scratch_operands = 0 : i64, tpu.core_type = #tpu.core_type<tc>, window_params = [{pipeline_mode = #tpu.pipeline_mode<synchronous>, transform_indices = @transform_0, window_bounds = array<i64: 1, 240>}, {pipeline_mode = #tpu.pipeline_mode<synchronous>, transform_indices = @transform_1, window_bounds = array<i64: 40, 240>}, {transform_indices = @transform_2, window_bounds = array<i64: 240, 256>}, {transform_indices = @transform_3, window_bounds = array<i64: 40, 256>}]} {
    %c0 = arith.constant 0 : index
    %c0_0 = arith.constant 0 : index
    %0 = vector.load %arg2[%c0, %c0_0] : memref<40x240xf32, #tpu.memory_space<vmem>>, vector<40x240xf32>
    %c0_1 = arith.constant 0 : index
    %c0_2 = arith.constant 0 : index
    %1 = vector.load %arg1[%c0_1, %c0_2] : memref<1x240xf32, #tpu.memory_space<vmem>>, vector<1x240xf32>
    %2 = vector.broadcast %1 : vector<1x240xf32> to vector<40x240xf32>
    %3 = arith.mulf %0, %2 : vector<40x240xf32>
    %c0_3 = arith.constant 0 : index
    %c0_4 = arith.constant 0 : index
    %4 = vector.load %arg3[%c0_3, %c0_4] : memref<240x256xf32, #tpu.memory_space<vmem>>, vector<240x256xf32>
    %cst = arith.constant dense<0.000000e+00> : vector<40x256xf32>
    %5 = tpu.matmul %3, %4, %cst {dimension_numbers = #tpu.dot_dimension_numbers<[1], [0], [0], [1], [0, 0, 1, 1], [], []>, precision = #tpu.contract_precision<fp32>} : vector<40x240xf32>, vector<240x256xf32>, vector<40x256xf32> -> vector<40x256xf32>
    %c0_5 = arith.constant 0 : index
    %c0_6 = arith.constant 0 : index
    %6 = vector.load %arg4[%c0_5, %c0_6] : memref<40x256xf32, #tpu.memory_space<vmem>>, vector<40x256xf32>
    tpu.vector_store %arg4[%c0_5, %c0_6], %5 {strides = array<i32>} : memref<40x256xf32, #tpu.memory_space<vmem>>, vector<40x256xf32>,
    return
  }
  func.func @transform_0(%arg0: i32) -> (i32, i32) {
    %c0_i32 = arith.constant 0 : i32
    %c0_i32_0 = arith.constant 0 : i32
    %c0_i32_1 = arith.constant 0 : i32
    return %c0_i32, %c0_i32_0 : i32, i32
  }
  func.func @transform_1(%arg0: i32) -> (i32, i32) {
    %c0_i32 = arith.constant 0 : i32
    %c0_i32_0 = arith.constant 0 : i32
    %c0_i32_1 = arith.constant 0 : i32
    return %c0_i32, %c0_i32_0 : i32, i32
  }
  func.func @transform_2(%arg0: i32) -> (i32, i32) {
    %c0_i32 = arith.constant 0 : i32
    %c0_i32_0 = arith.constant 0 : i32
    return %c0_i32, %arg0 : i32, i32
  }
  func.func @transform_3(%arg0: i32) -> (i32, i32) {
    %c0_i32 = arith.constant 0 : i32
    %c0_i32_0 = arith.constant 0 : i32
    return %c0_i32, %arg0 : i32, i32
  }
}

</mosaic_0001>

<bundles_post_ra>
// kernel: tpu_custom_call.1
= control target key start
LH: loop header
LB: loop body
LE: loop exit
PB: predicated region body
PF: predicated region fallthrough
CT: control target
= control target key end

     0   :  { %8 = vsyncpa [#allocation3], 0  ;;  %s3072_s0 = inlined_call_operand.hbm [shape: f32[1,240], index: 0, kind: input, shape index: {}]   ;;  %s3073_s1 = inlined_call_operand.hbm [shape: f32[40,240], index: 1, kind: input, shape index: {}]   ;;  %s3074_s2 = inlined_call_operand.hbm [shape: f32[240,256], index: 2, kind: input, shape index: {}]   ;;  %s3075_s3 = inlined_call_operand.hbm [shape: f32[40,256], index: 3, kind: output, shape index: {}]  }
   0x1   :  { %9 = vsyncpa [#allocation6], 0 }
   0x2   :  { %10 = vsyncpa [#allocation4], 0  ;;  %s2180_s12 = smov [#allocation5]   ;;  %s2086_s16 = scalar_lea.hbm %s3073_s1, 1280 }
   0x3   :  { %s26_s13 = sshll.u32 %s2180_s12, 4  ;;  %p2087_p0 = scmp.ne.s32.totalorder %s3073_s1, %s2086_s16  ;;  %s27_s13 = int_to_ptr.vmem [resolvable:$true] %s26_s13 }
   0x4   :  { %p2090_p1 = scmp.lt.u32.totalorder %s2086_s16, %s3073_s1 }
   0x6   :  { %p2092_p2 = pnand %p2090_p1, %p2087_p0 }
   0x8   :  { %2095 = shalt.err (!%p2092_p2)
}
   0x9   :  { %s2096_s21 = scalar_lea.vmem %s27_s13, 1280  ;;  %p2101_p4 = scmp.lt.s32.totalorder %s27_s13, %s27_s13 }
   0xa   :  { %p2097_p3 = scmp.ne.s32.totalorder %s27_s13, %s2096_s21  ;;  %p2102_p5 = scmp.lt.s32.totalorder %s2096_s21, %s2096_s21 }
   0xc   :  { %p2103_p6 = por %p2102_p5, %p2101_p4 }
   0xe   :  { %p2104_p7 = pnand %p2103_p6, %p2097_p3 }
  0x10   :  { %2107 = shalt.err (!%p2104_p7)
}
  0x11   :  { %s2181_s22 = smov 256   ;;  %s2182_s23 = smov 16  }
  0x12   :  { %32 = dma.hbm_to_vmem [thread:$0]  %s3073_s1, 1280, %s27_s13, [#allocation6], %s2181_s22, %s2181_s22, %s2182_s23  }
  0x13   :  { %s2183_s26 = smov [#allocation2]   ;;  %s2184_s28 = smov [#allocation7]  }
  0x14   :  { %s17_s27 = sshll.u32 %s2183_s26, 4  ;;  %s38_s29 = sshll.u32 %s2184_s28, 4  ;;  %s18_s27 = int_to_ptr.vmem [resolvable:$true] %s17_s27  ;;  %s39_s29 = int_to_ptr.vmem [resolvable:$true] %s38_s29 }
  0x15   :  { %s2108_s5 = scalar_lea.hbm %s3072_s0, 32 }
  0x16   :  { %p2109_p8 = scmp.ne.s32.totalorder %s3072_s0, %s2108_s5  ;;  %p2112_p9 = scmp.lt.u32.totalorder %s2108_s5, %s3072_s0 }
  0x18   :  { %p2114_p10 = pnand %p2112_p9, %p2109_p8 }
  0x1a   :  { %2117 = shalt.err (!%p2114_p10)
}
  0x1b   :  { %s2118_s1 = scalar_lea.vmem %s18_s27, 32  ;;  %p2123_p12 = scmp.lt.s32.totalorder %s18_s27, %s18_s27 }
  0x1c   :  { %p2119_p11 = scmp.ne.s32.totalorder %s18_s27, %s2118_s1  ;;  %p2124_p13 = scmp.lt.s32.totalorder %s2118_s1, %s2118_s1 }
  0x1e   :  { %p2125_p0 = por %p2124_p13, %p2123_p12 }
  0x20   :  { %p2126_p1 = pnand %p2125_p0, %p2119_p11 }
  0x22   :  { %2129 = shalt.err (!%p2126_p1)
}
  0x23   :  { %20 = dma.hbm_to_vmem [thread:$0]  %s3072_s0, 32, %s18_s27, [#allocation3]  }
  0x24   :  { %s2130_s14 = scalar_lea.hbm %s3074_s2, 7680 }
  0x25   :  { %p2131_p2 = scmp.ne.s32.totalorder %s3074_s2, %s2130_s14  ;;  %p2134_p3 = scmp.lt.u32.totalorder %s2130_s14, %s3074_s2 }
  0x27   :  { %p2136_p4 = pnand %p2134_p3, %p2131_p2 }
  0x29   :  { %2139 = shalt.err (!%p2136_p4)
}
  0x2a   :  { %s2140_s19 = scalar_lea.vmem %s39_s29, 7680  ;;  %p2145_p6 = scmp.lt.s32.totalorder %s39_s29, %s39_s29 }
  0x2b   :  { %p2141_p5 = scmp.ne.s32.totalorder %s39_s29, %s2140_s19  ;;  %p2146_p7 = scmp.lt.s32.totalorder %s2140_s19, %s2140_s19 }
  0x2d   :  { %p2147_p8 = por %p2146_p7, %p2145_p6 }
  0x2f   :  { %p2148_p9 = pnand %p2147_p8, %p2141_p5 }
  0x31   :  { %2151 = shalt.err (!%p2148_p9)
}
  0x32   :  { %44 = dma.hbm_to_vmem [thread:$0]  %s3074_s2, 7680, %s39_s29, [#allocation6], %s2181_s22, %s2181_s22, %s2182_s23  }
  0x33   :  { %2174 = dma.done.wait [#allocation3], 32  }
  0x34   :  { %2175 = vsyncadd [#allocation3], 4294967264 }
  0x35   :  { %2176 = dma.done.wait [#allocation6], 8960  }
  0x36   :  { %2177 = vsyncadd [#allocation6], 4294958336  ;;  %v66_v0 = vlaneseq  ;;  %v87_v2 = vld [vmem:[#allocation7 + $0x8] sm:$0xff]  ;;  %v89_v3 = vld [vmem:[#allocation7 + $0x18] sm:$0xff]  ;;  %vm146_vm0 = vcmask 916480   ;;  %s2185_s2 = smov [#allocation8]  }
  0x37   :  { %v86_v4 = vld [vmem:[#allocation7] sm:$0xff]  ;;  %v162_v5 = vand.u32 4294901760, %v87_v2  ;;  %v166_v6 = vand.u32 4294901760, %v89_v3  ;;  %v88_v7 = vld [vmem:[#allocation7 + $0x10] sm:$0xff]  ;;  %v91_v9 = vld [vmem:[#allocation7 + $0x28] sm:$0xff]  ;;  %s1657_s21 = sshll.u32 %s2185_s2, 4  ;;  %s1658_s21 = int_to_ptr.vmem [resolvable:$true] %s1657_s21 }
  0x38   :  { %v2248_v1 = vshrl.u32 %v66_v0, 7  ;;  %v164_v8 = vand.u32 4294901760, %v86_v4  ;;  %v93_v10 = vld [vmem:[#allocation7 + $0x38] sm:$0xff]  ;;  %v168_v11 = vand.u32 4294901760, %v88_v7  ;;  %v170_v12 = vand.u32 4294901760, %v91_v9  ;;  %v90_v14 = vld [vmem:[#allocation7 + $0x20] sm:$0xff]  ;;  %p2157_p11 = scmp.lt.s32.totalorder %s1658_s21, %s1658_s21 }
  0x39   :  { %v174_v13 = vand.u32 4294901760, %v93_v10  ;;  %v92_v15 = vld [vmem:[#allocation7 + $0x30] sm:$0xff]  ;;  %v95_v16 = vld [vmem:[#allocation7 + $0x48] sm:$0xff]  ;;  %v2250_v17 = vpack.c.bf16 %v166_v6, %v162_v5  ;;  %v97_v18 = vld [vmem:[#allocation7 + $0x58] sm:$0xff]  ;;  %v2254_v23 = vsub.f32 %v87_v2, %v162_v5  ;;  %v2256_v24 = vsub.f32 %v89_v3, %v166_v6  ;;  %s2152_s24 = scalar_lea.vmem %s1658_s21, 1280 }
  0x3a   :  { %v94_v19 = vld [vmem:[#allocation7 + $0x40] sm:$0xff]  ;;  %v96_v20 = vld [vmem:[#allocation7 + $0x50] sm:$0xff]  ;;  %v2258_v25 = vpack.c.bf16 %v168_v11, %v164_v8  ;;  %v99_v27 = vld [vmem:[#allocation7 + $0x68] sm:$0xff]  ;;  %v2264_v29 = vsub.f32 %v86_v4, %v164_v8  ;;  %v172_v30 = vand.u32 4294901760, %v90_v14  ;;  %v176_v31 = vand.u32 4294901760, %v92_v15  ;;  %p2153_p10 = scmp.ne.s32.totalorder %s1658_s21, %s2152_s24  ;;  %p2158_p12 = scmp.lt.s32.totalorder %s2152_s24, %s2152_s24 }
  0x3b   :  { %3190 = vst [vmem:[#allocation12_spill] sm:$0xff] %v2250_v17  ;;  %3191 = vst [vmem:[#allocation13_spill] sm:$0xff] %v2254_v23  ;;  %v2260_v26 = vpack.c.bf16 %v174_v13, %v170_v12  ;;  %v101_v28 = vld [vmem:[#allocation7 + $0x78] sm:$0xff]  ;;  %1671 = vmatprep.subr.bf16.mxu1 %v2250_v17  ;;  %1851 = vmatprep.subr.bf16.mxu0 %v2250_v17  ;;  %v178_v32 = vand.u32 4294901760, %v95_v16  ;;  %v2267_v33 = vsub.f32 %v88_v7, %v168_v11  ;;  %v98_v41 = vld [vmem:[#allocation7 + $0x60] sm:$0xff] }
  0x3c   :  { %3192 = vst [vmem:[#allocation14_spill] sm:$0xff] %v2256_v24  ;;  %3193 = vst [vmem:[#allocation15_spill] sm:$0xff] %v2258_v25  ;;  %1673 = vmatpush1.bf16.msra.mxu1 %v2258_v25  ;;  %1853 = vmatpush1.bf16.msra.mxu0 %v2258_v25  ;;  %v182_v34 = vand.u32 4294901760, %v97_v18  ;;  %v180_v35 = vand.u32 4294901760, %v94_v19  ;;  %v184_v36 = vand.u32 4294901760, %v96_v20  ;;  %v2271_v37 = vsub.f32 %v91_v9, %v170_v12  ;;  %v100_v42 = vld [vmem:[#allocation7 + $0x70] sm:$0xff]  ;;  %p2159_p13 = por %p2158_p12, %p2157_p11 }
  0x3d   :  { %3194 = vst [vmem:[#allocation16_spill] sm:$0xff] %v2260_v26  ;;  %3195 = vst [vmem:[#allocation17_spill] sm:$0xff] %v2264_v29  ;;  %1675 = vmatprep.subr.bf16.mxu1 %v2260_v26  ;;  %1855 = vmatprep.subr.bf16.mxu0 %v2260_v26  ;;  %v2274_v38 = vpack.c.bf16 %v176_v31, %v172_v30  ;;  %v186_v39 = vand.u32 4294901760, %v99_v27  ;;  %v190_v40 = vand.u32 4294901760, %v101_v28  ;;  %v103_v43 = vld [vmem:[#allocation7 + $0x88] sm:$0xff]  ;;  %v105_v48 = vld [vmem:[#allocation7 + $0x98] sm:$0xff] }
  0x3e   :  { %3196 = vst [vmem:[#allocation18_spill] sm:$0xff] %v2267_v33  ;;  %v2276_v44 = vsub.f32 %v93_v10, %v174_v13  ;;  %v2278_v45 = vsub.f32 %v90_v14, %v172_v30  ;;  %v2280_v46 = vsub.f32 %v92_v15, %v176_v31  ;;  %v2282_v47 = vpack.c.bf16 %v182_v34, %v178_v32  ;;  %v102_v49 = vld [vmem:[#allocation7 + $0x80] sm:$0xff]  ;;  %v104_v50 = vld [vmem:[#allocation7 + $0x90] sm:$0xff]  ;;  %v107_v55 = vld [vmem:[#allocation7 + $0xa8] sm:$0xff]  ;;  %p2160_p0 = pnand %p2159_p13, %p2153_p10 }
  0x3f   :  { %3197 = vst [vmem:[#allocation19_spill] sm:$0xff] %v2274_v38  ;;  %v2284_v51 = vsub.f32 %v95_v16, %v178_v32  ;;  %v2286_v52 = vsub.f32 %v97_v18, %v182_v34  ;;  %v2288_v53 = vpack.c.bf16 %v184_v36, %v180_v35  ;;  %v2290_v54 = vsub.f32 %v94_v19, %v180_v35  ;;  %v109_v0 = vld [vmem:[#allocation7 + $0xb8] sm:$0xff]  ;;  %v106_v2 = vld [vmem:[#allocation7 + $0xa0] sm:$0xff]  ;;  %v108_v7 = vld [vmem:[#allocation7 + $0xb0] sm:$0xff] }
  0x40   :  { %3198 = vst [vmem:[#allocation20_spill] sm:$0xff] %v2278_v45  ;;  %3199 = vst [vmem:[#allocation21_spill] sm:$0xff] %v2280_v46  ;;  %1677 = vmatpush1.bf16.msra.mxu1 %v2274_v38  ;;  %1857 = vmatpush1.bf16.msra.mxu0 %v2274_v38  ;;  %v2294_v56 = vsub.f32 %v96_v20, %v184_v36  ;;  %v188_v57 = vand.u32 4294901760, %v98_v41  ;;  %v192_v58 = vand.u32 4294901760, %v100_v42  ;;  %v194_v59 = vand.u32 4294901760, %v103_v43  ;;  %v111_v8 = vld [vmem:[#allocation7 + $0xc8] sm:$0xff] }
  0x41   :  { %3200 = vst [vmem:[#allocation22_spill] sm:$0xff] %v2282_v47  ;;  %3201 = vst [vmem:[#allocation23_spill] sm:$0xff] %v2284_v51  ;;  %1679 = vmatprep.subr.bf16.mxu1 %v2282_v47  ;;  %1859 = vmatprep.subr.bf16.mxu0 %v2282_v47  ;;  %v2298_v60 = vpack.c.bf16 %v190_v40, %v186_v39  ;;  %v198_v61 = vand.u32 4294901760, %v105_v48  ;;  %v196_v62 = vand.u32 4294901760, %v102_v49  ;;  %v200_v63 = vand.u32 4294901760, %v104_v50  ;;  %v113_v9 = vld [vmem:[#allocation7 + $0xd8] sm:$0xff] }
  0x42   :  { %3202 = vst [vmem:[#allocation24_spill] sm:$0xff] %v2286_v52  ;;  %3203 = vst [vmem:[#allocation25_spill] sm:$0xff] %v2288_v53  ;;  %v2300_v3 = vsub.f32 %v99_v27, %v186_v39  ;;  %v2302_v4 = vsub.f32 %v101_v28, %v190_v40  ;;  %v2304_v5 = vpack.c.bf16 %v192_v58, %v188_v57  ;;  %v202_v6 = vand.u32 4294901760, %v107_v55  ;;  %v110_v14 = vld [vmem:[#allocation7 + $0xc0] sm:$0xff]  ;;  %v112_v15 = vld [vmem:[#allocation7 + $0xd0] sm:$0xff] }
  0x43   :  { %3204 = vst [vmem:[#allocation26_spill] sm:$0xff] %v2290_v54  ;;  %3205 = vst [vmem:[#allocation27_spill] sm:$0xff] %v2294_v56  ;;  %v2306_v10 = vsub.f32 %v98_v41, %v188_v57  ;;  %v2308_v11 = vsub.f32 %v100_v42, %v192_v58  ;;  %v2310_v12 = vpack.c.bf16 %v198_v61, %v194_v59  ;;  %v206_v19 = vand.u32 4294901760, %v109_v0  ;;  %v115_v32 = vld [vmem:[#allocation7 + $0xe8] sm:$0xff]  ;;  %v117_v40 = vld [vmem:[#allocation7 + $0xf8] sm:$0xff] }
  0x44   :  { %3206 = vst [vmem:[#allocation28_spill] sm:$0xff] %v2298_v60  ;;  %3207 = vst [vmem:[#allocation29_spill] sm:$0xff] %v2304_v5  ;;  %v2312_v13 = vsub.f32 %v103_v43, %v194_v59  ;;  %1681 = vmatpush1.bf16.msra.mxu1 %v2288_v53  ;;  %1861 = vmatpush1.bf16.msra.mxu0 %v2288_v53  ;;  %v2316_v16 = vsub.f32 %v105_v48, %v198_v61  ;;  %v204_v20 = vand.u32 4294901760, %v106_v2  ;;  %v114_v41 = vld [vmem:[#allocation7 + $0xe0] sm:$0xff]  ;;  %v116_v42 = vld [vmem:[#allocation7 + $0xf0] sm:$0xff] }
  0x45   :  { %3208 = vst [vmem:[#allocation30_spill] sm:$0xff] %v2310_v12  ;;  %v2318_v18 = vpack.c.bf16 %v200_v63, %v196_v62  ;;  %1683 = vmatprep.subr.bf16.mxu1 %v2298_v60  ;;  %1863 = vmatprep.subr.bf16.mxu0 %v2298_v60  ;;  %v2322_v27 = vsub.f32 %v102_v49, %v196_v62  ;;  %v208_v28 = vand.u32 4294901760, %v108_v7  ;;  %v210_v30 = vand.u32 4294901760, %v111_v8  ;;  %v119_v58 = vld [vmem:[#allocation7 + $0x108] sm:$0xff]  ;;  %v121_v59 = vld [vmem:[#allocation7 + $0x118] sm:$0xff]  ;;  %v128_v17 = vld [vmem:[#allocation7 + $0x150] sm:$0xff] }
  0x46   :  { %v214_v31 = vand.u32 4294901760, %v113_v9  ;;  %v2324_v34 = vsub.f32 %v104_v50, %v200_v63  ;;  %v2326_v35 = vsub.f32 %v107_v55, %v202_v6  ;;  %v212_v36 = vand.u32 4294901760, %v110_v14  ;;  %v118_v63 = vld [vmem:[#allocation7 + $0x100] sm:$0xff]  ;;  %v129_v25 = vld [vmem:[#allocation7 + $0x158] sm:$0xff] }
  0x47   :  { %3209 = vst [vmem:[#allocation31_spill] sm:$0xff] %v2318_v18  ;;  %v216_v39 = vand.u32 4294901760, %v112_v15  ;;  %v2328_v43 = vpack.c.bf16 %v206_v19, %v202_v6  ;;  %v2330_v48 = vsub.f32 %v109_v0, %v206_v19  ;;  %v2332_v57 = vpack.c.bf16 %v208_v28, %v204_v20 }
  0x48   :  { %v2334_v49 = vsub.f32 %v106_v2, %v204_v20  ;;  %1685 = vmatpush1.bf16.msra.mxu1 %v2304_v5  ;;  %1865 = vmatpush1.bf16.msra.mxu0 %v2304_v5  ;;  %v2338_v50 = vsub.f32 %v108_v7, %v208_v28  ;;  %v2340_v55 = vpack.c.bf16 %v214_v31, %v210_v30  ;;  %v218_v62 = vand.u32 4294901760, %v115_v32  ;;  %v120_v20 = vld [vmem:[#allocation7 + $0x110] sm:$0xff] }
  0x49   :  { %3210 = vst [vmem:[#allocation32_spill] sm:$0xff] %v2328_v43  ;;  %3211 = vst [vmem:[#allocation33_spill] sm:$0xff] %v2332_v57  ;;  %v2342_v61 = vsub.f32 %v111_v8, %v210_v30  ;;  %1687 = vmatprep.subr.bf16.mxu1 %v2310_v12  ;;  %1867 = vmatprep.subr.bf16.mxu0 %v2310_v12  ;;  %v2346_v0 = vsub.f32 %v113_v9, %v214_v31  ;;  %v222_v2 = vand.u32 4294901760, %v117_v40  ;;  %v123_v8 = vld [vmem:[#allocation7 + $0x128] sm:$0xff]  ;;  %v125_v30 = vld [vmem:[#allocation7 + $0x138] sm:$0xff] }
  0x4a   :  { %3212 = vst [vmem:[#allocation34_spill] sm:$0xff] %v2338_v50  ;;  %3213 = vst [vmem:[#allocation35_spill] sm:$0xff] %v2340_v55  ;;  %v220_v6 = vand.u32 4294901760, %v114_v41  ;;  %v224_v19 = vand.u32 4294901760, %v116_v42  ;;  %v2348_v22 = vpack.c.bf16 %v216_v39, %v212_v36  ;;  %v2350_v7 = vsub.f32 %v110_v14, %v212_v36  ;;  %v122_v31 = vld [vmem:[#allocation7 + $0x120] sm:$0xff]  ;;  %v124_v12 = vld [vmem:[#allocation7 + $0x130] sm:$0xff] }
  0x4b   :  { %3214 = vst [vmem:[#allocation36_spill] sm:$0xff] %v2342_v61  ;;  %3215 = vst [vmem:[#allocation37_spill] sm:$0xff] %v2346_v0  ;;  %v226_v28 = vand.u32 4294901760, %v119_v58  ;;  %v230_v21 = vand.u32 4294901760, %v121_v59  ;;  %v2352_v5 = vsub.f32 %v112_v15, %v216_v39  ;;  %v2354_v60 = vpack.c.bf16 %v222_v2, %v218_v62  ;;  %v127_v15 = vld [vmem:[#allocation7 + $0x148] sm:$0xff]  ;;  %v144_v0 = vld [vmem:[#allocation7 + $0x1d0] sm:$0xff] }
  0x4c   :  { %3216 = vst [vmem:[#allocation38_spill] sm:$0xff] %v2348_v22  ;;  %3217 = vst [vmem:[#allocation39_spill] sm:$0xff] %v2350_v7  ;;  %v2356_v53 = vsub.f32 %v115_v32, %v218_v62  ;;  %v228_v9 = vand.u32 4294901760, %v118_v63  ;;  %1689 = vmatpush1.bf16.msra.mxu1 %v2318_v18  ;;  %1869 = vmatpush1.bf16.msra.mxu0 %v2318_v18  ;;  %v2360_v47 = vsub.f32 %v117_v40, %v222_v2 }
  0x4d   :  { %3218 = vst [vmem:[#allocation40_spill] sm:$0xff] %v2352_v5  ;;  %3219 = vst [vmem:[#allocation41_spill] sm:$0xff] %v2354_v60  ;;  %v2362_v14 = vpack.c.bf16 %v224_v19, %v220_v6  ;;  %v2364_v36 = vsub.f32 %v114_v41, %v220_v6  ;;  %v232_v38 = vand.u32 4294901760, %v120_v20  ;;  %1691 = vmatprep.subr.bf16.mxu1 %v2328_v43  ;;  %1871 = vmatprep.subr.bf16.mxu0 %v2328_v43  ;;  %v126_v6 = vld [vmem:[#allocation7 + $0x140] sm:$0xff] }
  0x4e   :  { %3220 = vst [vmem:[#allocation42_spill] sm:$0xff] %v2356_v53  ;;  %3221 = vst [vmem:[#allocation43_spill] sm:$0xff] %v2360_v47  ;;  %v2368_v32 = vsub.f32 %v116_v42, %v224_v19  ;;  %v2370_v39 = vpack.c.bf16 %v230_v21, %v226_v28  ;;  %v234_v62 = vand.u32 4294901760, %v123_v8  ;;  %v238_v26 = vand.u32 4294901760, %v125_v30  ;;  %v131_v19 = vld [vmem:[#allocation7 + $0x168] sm:$0xff] }
  0x4f   :  { %3222 = vst [vmem:[#allocation44_spill] sm:$0xff] %v2362_v14  ;;  %3223 = vst [vmem:[#allocation45_spill] sm:$0xff] %v2364_v36  ;;  %v2372_v18 = vsub.f32 %v119_v58, %v226_v28  ;;  %v2374_v40 = vsub.f32 %v121_v59, %v230_v21  ;;  %v236_v2 = vand.u32 4294901760, %v122_v31  ;;  %v240_v41 = vand.u32 4294901760, %v124_v12 }
  0x50   :  { %3224 = vst [vmem:[#allocation46_spill] sm:$0xff] %v2368_v32  ;;  %3225 = vst [vmem:[#allocation47_spill] sm:$0xff] %v2370_v39  ;;  %v2376_v36 = vpack.c.bf16 %v232_v38, %v228_v9  ;;  %v2378_v47 = vsub.f32 %v118_v63, %v228_v9  ;;  %v2380_v43 = vsub.f32 %v120_v20, %v232_v38  ;;  %v242_v42 = vand.u32 4294901760, %v127_v15  ;;  %v133_v32 = vld [vmem:[#allocation7 + $0x178] sm:$0xff] }
  0x51   :  { %3226 = vst [vmem:[#allocation48_spill] sm:$0xff] %v2372_v18  ;;  %3227 = vst [vmem:[#allocation49_spill] sm:$0xff] %v2374_v40  ;;  %1693 = vmatpush1.bf16.msra.mxu1 %v2332_v57  ;;  %1873 = vmatpush1.bf16.msra.mxu0 %v2332_v57  ;;  %v2384_v58 = vpack.c.bf16 %v238_v26, %v234_v62  ;;  %v2386_v21 = vsub.f32 %v123_v8, %v234_v62  ;;  %v246_v28 = vand.u32 4294901760, %v129_v25  ;;  %v130_v40 = vld [vmem:[#allocation7 + $0x160] sm:$0xff]  ;;  %v135_v57 = vld [vmem:[#allocation7 + $0x188] sm:$0xff] }
  0x52   :  { %3228 = vst [vmem:[#allocation50_spill] sm:$0xff] %v2376_v36  ;;  %3229 = vst [vmem:[#allocation51_spill] sm:$0xff] %v2378_v47  ;;  %v2388_v59 = vsub.f32 %v125_v30, %v238_v26  ;;  %1695 = vmatprep.subr.bf16.mxu1 %v2340_v55  ;;  %1875 = vmatprep.subr.bf16.mxu0 %v2340_v55  ;;  %v2392_v38 = vpack.c.bf16 %v240_v41, %v236_v2  ;;  %v244_v20 = vand.u32 4294901760, %v126_v6  ;;  %v137_v62 = vld [vmem:[#allocation7 + $0x198] sm:$0xff] }
  0x53   :  { %3230 = vst [vmem:[#allocation52_spill] sm:$0xff] %v2380_v43  ;;  %3231 = vst [vmem:[#allocation53_spill] sm:$0xff] %v2384_v58  ;;  %v2394_v63 = vsub.f32 %v122_v31, %v236_v2  ;;  %v248_v9 = vand.u32 4294901760, %v128_v17  ;;  %v132_v43 = vld [vmem:[#allocation7 + $0x170] sm:$0xff]  ;;  %v2396_v47 = vsub.f32 %v124_v12, %v240_v41  ;;  %v2398_v8 = vsub.f32 %v127_v15, %v242_v42  ;;  %v139_v2 = vld [vmem:[#allocation7 + $0x1a8] sm:$0xff] }
  0x54   :  { %3232 = vst [vmem:[#allocation54_spill] sm:$0xff] %v2386_v21  ;;  %3233 = vst [vmem:[#allocation55_spill] sm:$0xff] %v2388_v59  ;;  %v250_v26 = vand.u32 4294901760, %v131_v19  ;;  %v254_v30 = vand.u32 4294901760, %v133_v32  ;;  %v134_v59 = vld [vmem:[#allocation7 + $0x180] sm:$0xff]  ;;  %v136_v21 = vld [vmem:[#allocation7 + $0x190] sm:$0xff]  ;;  %v2400_v18 = vpack.c.bf16 %v246_v28, %v242_v42  ;;  %v2402_v55 = vsub.f32 %v129_v25, %v246_v28 }
  0x55   :  { %3234 = vst [vmem:[#allocation56_spill] sm:$0xff] %v2392_v38  ;;  %3235 = vst [vmem:[#allocation57_spill] sm:$0xff] %v2394_v63  ;;  %v2404_v53 = vpack.c.bf16 %v248_v9, %v244_v20  ;;  %v252_v31 = vand.u32 4294901760, %v130_v40  ;;  %v141_v63 = vld [vmem:[#allocation7 + $0x1b8] sm:$0xff]  ;;  %1697 = vmatpush1.bf16.msra.mxu1 %v2348_v22  ;;  %1877 = vmatpush1.bf16.msra.mxu0 %v2348_v22  ;;  %v2408_v12 = vsub.f32 %v126_v6, %v244_v20 }
  0x56   :  { %3236 = vst [vmem:[#allocation58_spill] sm:$0xff] %v2396_v47  ;;  %3237 = vst [vmem:[#allocation59_spill] sm:$0xff] %v2398_v8  ;;  %v2410_v15 = vsub.f32 %v128_v17, %v248_v9  ;;  %v2412_v41 = vsub.f32 %v131_v19, %v250_v26  ;;  %v256_v8 = vand.u32 4294901760, %v132_v43  ;;  %1699 = vmatprep.subr.bf16.mxu1 %v2354_v60  ;;  %1879 = vmatprep.subr.bf16.mxu0 %v2354_v60  ;;  %v138_v47 = vld [vmem:[#allocation7 + $0x1a0] sm:$0xff]  ;;  %v140_v17 = vld [vmem:[#allocation7 + $0x1b0] sm:$0xff] }
  0x57   :  { %3238 = vst [vmem:[#allocation60_spill] sm:$0xff] %v2400_v18  ;;  %3239 = vst [vmem:[#allocation61_spill] sm:$0xff] %v2402_v55  ;;  %v258_v25 = vand.u32 4294901760, %v135_v57  ;;  %v262_v42 = vand.u32 4294901760, %v137_v62  ;;  %v260_v28 = vand.u32 4294901760, %v134_v59  ;;  %v264_v55 = vand.u32 4294901760, %v136_v21 }
  0x58   :  { %3240 = vst [vmem:[#allocation62_spill] sm:$0xff] %v2404_v53  ;;  %3241 = vst [vmem:[#allocation63_spill] sm:$0xff] %v2408_v12  ;;  %v2416_v5 = vpack.c.bf16 %v254_v30, %v250_v26  ;;  %v2418_v7 = vsub.f32 %v133_v32, %v254_v30  ;;  %v266_v6 = vand.u32 4294901760, %v139_v2  ;;  %v270_v20 = vand.u32 4294901760, %v141_v63  ;;  %v143_v9 = vld [vmem:[#allocation7 + $0x1c8] sm:$0xff]  ;;  %v142_v12 = vld [vmem:[#allocation7 + $0x1c0] sm:$0xff] }
  0x59   :  { %3242 = vst [vmem:[#allocation64_spill] sm:$0xff] %v2410_v15  ;;  %3243 = vst [vmem:[#allocation65_spill] sm:$0xff] %v2412_v41  ;;  %v2420_v19 = vpack.c.bf16 %v256_v8, %v252_v31  ;;  %v2422_v22 = vsub.f32 %v130_v40, %v252_v31  ;;  %v2424_v41 = vsub.f32 %v132_v43, %v256_v8  ;;  %v145_v15 = vld [vmem:[#allocation7 + $0x1d8] sm:$0xff]  ;;  %1701 = vmatpush1.bf16.msra.mxu1 %v2362_v14 }
  0x5a   :  { %3244 = vst [vmem:[#allocation66_spill] sm:$0xff] %v2416_v5  ;;  %3245 = vst [vmem:[#allocation67_spill] sm:$0xff] %v2418_v7  ;;  %v2426_v60 = vpack.c.bf16 %v262_v42, %v258_v25  ;;  %1881 = vmatpush1.bf16.msra.mxu0 %v2362_v14  ;;  %v2430_v32 = vsub.f32 %v135_v57, %v258_v25  ;;  %v2432_v26 = vsub.f32 %v137_v62, %v262_v42  ;;  %v64_v42 = vld [vmem:[#allocation2] sm:$0x3] }
  0x5b   :  { %3246 = vst [vmem:[#allocation68_spill] sm:$0xff] %v2420_v19  ;;  %3247 = vst [vmem:[#allocation69_spill] sm:$0xff] %v2424_v41  ;;  %v2434_v30 = vpack.c.bf16 %v264_v55, %v260_v28  ;;  %v268_v7 = vand.u32 4294901760, %v138_v47  ;;  %1703 = vmatprep.subr.bf16.mxu1 %v2370_v39  ;;  %1883 = vmatprep.subr.bf16.mxu0 %v2370_v39  ;;  %v2438_v43 = vsub.f32 %v134_v59, %v260_v28  ;;  %v55_v28 = vld [vmem:[#allocation5 + $0x8] sm:$0xff] }
  0x5c   :  { %3248 = vst [vmem:[#allocation70_spill] sm:$0xff] %v2426_v60  ;;  %3249 = vst [vmem:[#allocation71_spill] sm:$0xff] %v2430_v32  ;;  %v2440_v40 = vsub.f32 %v136_v21, %v264_v55  ;;  %v272_v8 = vand.u32 4294901760, %v140_v17  ;;  %v274_v31 = vand.u32 4294901760, %v143_v9  ;;  %v2442_v14 = vpack.c.bf16 %v270_v20, %v266_v6  ;;  %v54_v55 = vld [vmem:[#allocation5] sm:$0xff] }
  0x5d   :  { %3250 = vst [vmem:[#allocation72_spill] sm:$0xff] %v2432_v26  ;;  %3251 = vst [vmem:[#allocation73_spill] sm:$0xff] %v2434_v30  ;;  %v2444_v57 = vsub.f32 %v139_v2, %v266_v6  ;;  %v2446_v62 = vsub.f32 %v141_v63, %v270_v20  ;;  %v278_v25 = vand.u32 4294901760, %v145_v15  ;;  %v2448_v26 = vsub.f32 %v138_v47, %v268_v7 }
  0x5e   :  { %3252 = vst [vmem:[#allocation74_spill] sm:$0xff] %v2442_v14  ;;  %v276_v32 = vand.u32 4294901760, %v142_v12  ;;  %v280_v41 = vand.u32 4294901760, %v144_v0  ;;  %v3253_v39 = vsub.s32 0, %v2248_v1  ;;  %1705 = vmatpush1.bf16.msra.mxu1 %v2376_v36  ;;  %1885 = vmatpush1.bf16.msra.mxu0 %v2376_v36  ;;  %v2456_v21 = vpack.c.bf16 %v272_v8, %v268_v7 }
  0x5f   :  { %v2458_v2 = vsub.f32 %v140_v17, %v272_v8  ;;  %v2460_v63 = vsub.f32 %v143_v9, %v274_v31  ;;  %v369_v47 = vand.u32 4294901760, %v2254_v23  ;;  %1707 = vmatprep.subr.bf16.mxu1 %v2384_v58  ;;  %1887 = vmatprep.subr.bf16.mxu0 %v2384_v58  ;;  %v2467_v6 = vsub.f32 %v145_v15, %v278_v25 }
  0x60   :  { %v2452_v59 = vrot.slane %v64_v42, %v3253_v39  ;;  %3254 = vst [vmem:[#allocation75_spill] sm:$0xff] %v2456_v21  ;;  %v2465_v39 = vpack.c.bf16 %v278_v25, %v274_v31  ;;  %v3259_v20 = vsub.s32 1, %v2248_v1  ;;  %v381_v7 = vand.u32 4294901760, %v2256_v24 }
  0x61   :  { %3255 = vst [vmem:[#allocation76_spill] sm:$0xff] %v2458_v2  ;;  %3256 = vst [vmem:[#allocation77_spill] sm:$0xff] %v2460_v63  ;;  %v370_v17 = vsub.f32 %v2254_v23, %v369_v47  ;;  %v375_v8 = vand.u32 4294901760, %v2264_v29  ;;  %v387_v63 = vand.u32 4294901760, %v2267_v33  ;;  %v2478_v2 = vpack.c.bf16 %v280_v41, %v276_v32 }
  0x62   :  { %3257 = vst [vmem:[#allocation78_spill] sm:$0xff] %v2465_v39  ;;  %3258 = vst [vmem:[#allocation79_spill] sm:$0xff] %v2467_v6  ;;  %v2471_v36 = vrot.slane %v64_v42, %v3259_v20  ;;  %v76_v9 = vmul.f32 %v2452_v59, %v54_v55  ;;  %v382_v15 = vsub.f32 %v2256_v24, %v381_v7  ;;  %v393_v1 = vand.u32 4294901760, %v2271_v37 }
  0x63   :  { %3260 = vst [vmem:[#allocation80_spill] sm:$0xff] %v2478_v2  ;;  %1709 = vmatpush1.bf16.msra.mxu1 %v2392_v38  ;;  %1889 = vmatpush1.bf16.msra.mxu0 %v2392_v38  ;;  %v2485_v25 = vsub.f32 %v142_v12, %v276_v32  ;;  %v376_v55 = vsub.f32 %v2264_v29, %v375_v8  ;;  %v371_v24 = vand.u32 4294901760, %v370_v17  ;;  %v411_v17 = vand.u32 4294901760, %v2280_v46 }
  0x64   :  { %v77_v31 = vmul.f32 %v2471_v36, %v55_v28  ;;  %v2487_v42 = vand.u32 4294901760, %v76_v9  ;;  %v388_v20 = vsub.f32 %v2267_v33, %v387_v63  ;;  %1711 = vmatprep.subr.bf16.mxu1 %v2400_v18  ;;  %1891 = vmatprep.subr.bf16.mxu0 %v2400_v18  ;;  %v2493_v28 = vsub.f32 %v144_v0, %v280_v41 }
  0x65   :  { %3261 = vst [vmem:[#allocation81_spill] sm:$0xff] %v2485_v25  ;;  %v383_v23 = vand.u32 4294901760, %v382_v15  ;;  %v2498_v12 = vpack.c.bf16 %v381_v7, %v369_v47  ;;  %v394_v38 = vsub.f32 %v2271_v37, %v393_v1  ;;  %v377_v33 = vand.u32 4294901760, %v376_v55 }
  0x66   :  { %3262 = vst [vmem:[#allocation82_spill] sm:$0xff] %v2487_v42  ;;  %v148_v58 = vsel %vm146_vm0, %v77_v31, 0  ;;  %v2501_v32 = vsub.f32 %v76_v9, %v2487_v42  ;;  %v389_v29 = vand.u32 4294901760, %v388_v20  ;;  %v405_v25 = vand.u32 4294901760, %v2276_v44 }
  0x67   :  { %v2496_v6 = vand.u32 4294901760, %v148_v58  ;;  %v399_v0 = vand.u32 4294901760, %v2278_v45  ;;  %1713 = vmatpush1.bf16.msra.mxu1 %v2404_v53  ;;  %1893 = vmatpush1.bf16.msra.mxu0 %v2404_v53  ;;  %v2512_v7 = vpack.c.bf16 %v387_v63, %v375_v8  ;;  %v2517_v9 = vpack.c.bf16 %v383_v23, %v371_v24 }
  0x68   :  { %3264 = vst [vmem:[#allocation84_spill] sm:$0xff] %v2501_v32  ;;  %v3132_v47 = vand.u32 4294901760, %v2501_v32  ;;  %1715 = vmatprep.subr.bf16.mxu1 %v2416_v5  ;;  %1895 = vmatprep.subr.bf16.mxu0 %v2416_v5  ;;  %v406_v31 = vsub.f32 %v2276_v44, %v405_v25  ;;  %v417_v55 = vand.u32 4294901760, %v2284_v51  ;;  %v395_v8 = vand.u32 4294901760, %v394_v38 }
  0x69   :  { %3263 = vst [vmem:[#allocation83_spill] sm:$0xff] %v2496_v6  ;;  %v2509_v41 = vsub.f32 %v148_v58, %v2496_v6  ;;  %v400_v15 = vsub.f32 %v2278_v45, %v399_v0  ;;  %v412_v20 = vsub.f32 %v2280_v46, %v411_v17  ;;  %v2529_v53 = vpack.c.bf16 %v389_v29, %v377_v33 }
  0x6a   :  { %v2526_v63 = vsub.f32 %v2501_v32, %v3132_v47  ;;  %v407_v23 = vand.u32 4294901760, %v406_v31  ;;  %v418_v24 = vsub.f32 %v2284_v51, %v417_v55  ;;  %v429_v5 = vand.u32 4294901760, %v2286_v52 }
  0x6b   :  { %3265 = vst [vmem:[#allocation85_spill] sm:$0xff] %v2509_v41  ;;  %v288_v58 = vand.u32 4294901760, %v2509_v41  ;;  %1717 = vmatpush1.bf16.msra.mxu1 %v2420_v19  ;;  %1897 = vmatpush1.bf16.msra.mxu0 %v2420_v19  ;;  %v2536_v45 = vpack.c.bf16 %v405_v25, %v393_v1  ;;  %v2538_v47 = vpack.c.bf16 %v411_v17, %v399_v0  ;;  %v423_v38 = vand.u32 4294901760, %v2290_v54 }
  0x6c   :  { %1719 = vmatprep.subr.bf16.mxu1 %v2426_v60  ;;  %1899 = vmatprep.subr.bf16.mxu0 %v2426_v60  ;;  %v401_v33 = vand.u32 4294901760, %v400_v15  ;;  %v413_v31 = vand.u32 4294901760, %v412_v20  ;;  %v430_v51 = vsub.f32 %v2286_v52, %v429_v5  ;;  %v2545_v19 = vpack.c.bf16 %v407_v23, %v395_v8 }
  0x6d   :  { %v289_v18 = vsub.f32 %v2509_v41, %v288_v58  ;;  %1134 = vmatprep.mubr.f32.mxu0 %v288_v58  ;;  %v424_v1 = vsub.f32 %v2290_v54, %v423_v38  ;;  %v435_v25 = vand.u32 4294901760, %v2294_v56  ;;  %v419_v0 = vand.u32 4294901760, %v418_v24 }
  0x6e   :  { %v441_v17 = vand.u32 4294901760, %v2300_v3  ;;  %v453_v41 = vand.u32 4294901760, %v2302_v4  ;;  %v447_v60 = vand.u32 4294901760, %v2306_v10  ;;  %v431_v15 = vand.u32 4294901760, %v430_v51 }
  0x6f   :  { %v290_v46 = vand.u32 4294901760, %v289_v18  ;;  %1721 = vmatpush1.bf16.msra.mxu1 %v2434_v30  ;;  %1901 = vmatpush1.bf16.msra.mxu0 %v2434_v30  ;;  %v2554_v18 = vpack.c.bf16 %v429_v5, %v417_v55  ;;  %v436_v58 = vsub.f32 %v2294_v56, %v435_v25  ;;  %v459_v8 = vand.u32 4294901760, %v2308_v11 }
  0x70   :  { %1723 = vmatprep.subr.bf16.mxu1 %v2442_v14  ;;  %1903 = vmatprep.subr.bf16.mxu0 %v2442_v14  ;;  %v2560_v20 = vpack.c.bf16 %v413_v31, %v401_v33  ;;  %v442_v23 = vsub.f32 %v2300_v3, %v441_v17  ;;  %v454_v24 = vsub.f32 %v2302_v4, %v453_v41  ;;  %v465_v29 = vand.u32 4294901760, %v2312_v13 }
  0x71   :  { %291 = vmatprep.mubr.f32.mxu1 %v290_v46  ;;  %v425_v51 = vand.u32 4294901760, %v424_v1  ;;  %v437_v5 = vand.u32 4294901760, %v436_v58  ;;  %v448_v55 = vsub.f32 %v2306_v10, %v447_v60  ;;  %v460_v30 = vsub.f32 %v2308_v11, %v459_v8 }
  0x72   :  { %v2567_v56 = vpack.c.bf16 %v435_v25, %v423_v38  ;;  %v443_v54 = vand.u32 4294901760, %v442_v23  ;;  %v455_v52 = vand.u32 4294901760, %v454_v24  ;;  %v466_v33 = vsub.f32 %v2312_v13, %v465_v29 }
  0x73   :  { %1725 = vmatpush1.bf16.msra.mxu1 %v2456_v21  ;;  %1905 = vmatpush1.bf16.msra.mxu0 %v2456_v21  ;;  %v2572_v31 = vpack.c.bf16 %v431_v15, %v419_v0  ;;  %v449_v14 = vand.u32 4294901760, %v448_v55  ;;  %v461_v46 = vand.u32 4294901760, %v460_v30  ;;  %v477_v1 = vand.u32 4294901760, %v2316_v16 }
  0x74   :  { %1727 = vmatprep.subr.bf16.mxu1 %v2465_v39  ;;  %1907 = vmatprep.subr.bf16.mxu0 %v2465_v39  ;;  %v2577_v38 = vpack.c.bf16 %v453_v41, %v441_v17  ;;  %v2579_v25 = vpack.c.bf16 %v459_v8, %v447_v60  ;;  %v471_v58 = vand.u32 4294901760, %v2322_v27  ;;  %v483_v23 = vand.u32 4294901760, %v2324_v34 }
  0x75   :  { %v2583_v24 = vpack.c.bf16 %v437_v5, %v425_v51  ;;  %v2585_v0 = vpack.c.bf16 %v455_v52, %v443_v54  ;;  %v478_v30 = vsub.f32 %v2316_v16, %v477_v1  ;;  %v489_v15 = vand.u32 4294901760, %v2326_v35 }
  0x76   :  { %v467_v55 = vand.u32 4294901760, %v466_v33  ;;  %v472_v21 = vsub.f32 %v2322_v27, %v471_v58  ;;  %v484_v41 = vsub.f32 %v2324_v34, %v483_v23  ;;  %v501_v60 = vand.u32 4294901760, %v2330_v48 }
  0x77   :  { %1729 = vmatpush1.bf16.msra.mxu1 %v2478_v2  ;;  %1909 = vmatpush1.bf16.msra.mxu0 %v2478_v2  ;;  %v2594_v17 = vpack.c.bf16 %v461_v46, %v449_v14  ;;  %v490_v52 = vsub.f32 %v2326_v35, %v489_v15  ;;  %v495_v54 = vand.u32 4294901760, %v2334_v49  ;;  %v507_v8 = vand.u32 4294901760, %v2338_v50 }
  0x78   :  { %1731 = vmatprep.subr.bf16.mxu1 %v2517_v9  ;;  %1911 = vmatprep.subr.bf16.mxu0 %v2498_v12  ;;  %v479_v51 = vand.u32 4294901760, %v478_v30  ;;  %v2601_v5 = vpack.c.bf16 %v477_v1, %v465_v29  ;;  %v2603_v33 = vpack.c.bf16 %v483_v23, %v471_v58  ;;  %v502_v39 = vsub.f32 %v2330_v48, %v501_v60  ;;  %v3268_v23 = vld [vmem:[#allocation37_spill] sm:$0xff] }
  0x79   :  { %v473_v2 = vand.u32 4294901760, %v472_v21  ;;  %v485_v14 = vand.u32 4294901760, %v484_v41  ;;  %v496_v46 = vsub.f32 %v2334_v49, %v495_v54  ;;  %v508_v42 = vsub.f32 %v2338_v50, %v507_v8  ;;  %v3269_v50 = vld [vmem:[#allocation39_spill] sm:$0xff] }
  0x7a   :  { %v3266_v6 = vand.u32 4294901760, %v2526_v63  ;;  %v3267_v9 = vand.u32 4294901760, %v2501_v32  ;;  %v491_v12 = vand.u32 4294901760, %v490_v52  ;;  %v503_v30 = vand.u32 4294901760, %v502_v39  ;;  %v3271_v52 = vld [vmem:[#allocation42_spill] sm:$0xff] }
  0x7b   :  { %v2612_v29 = vpack.c.bf16 %v501_v60, %v489_v15  ;;  %v513_v1 = vand.u32 4294901760, %v2342_v61  ;;  %v497_v21 = vand.u32 4294901760, %v496_v46  ;;  %v509_v58 = vand.u32 4294901760, %v508_v42  ;;  %v3270_v15 = vld [vmem:[#allocation40_spill] sm:$0xff] }
  0x7c   :  { %297 = vmatmul.mubr.f32.vlgmr.msra.gmra.mrb[0].mxu1 %v3266_v6  ;;  %1138 = vmatmul.mubr.f32.vlgmr.msra.gmra.mrb[0].mxu0 %v3267_v9  ;;  %v525_v41 = vand.u32 4294901760, %v3268_v23  ;;  %v519_v63 = vand.u32 4294901760, %v3269_v50  ;;  %v1746_v6 = vpack.c.bf16 %v479_v51, %v467_v55  ;;  %v531_v60 = vand.u32 4294901760, %v3270_v15 }
  0x7d   :  { %1733 = vmatpush1.bf16.msra.mxu1 %v2529_v53  ;;  %1913 = vmatpush1.bf16.msra.mxu0 %v2512_v7  ;;  %v514_v39 = vsub.f32 %v2342_v61, %v513_v1  ;;  %v537_v9 = vand.u32 4294901760, %v3271_v52  ;;  %v2624_v53 = vpack.c.bf16 %v485_v14, %v473_v2  ;;  %v2626_v7 = vpack.c.bf16 %v507_v8, %v495_v54  ;;  %v3272_v54 = vld [vmem:[#allocation43_spill] sm:$0xff]  ;;  %v3273_v14 = vld [vmem:[#allocation45_spill] sm:$0xff] }
  0x7e   :  { %1735 = vmatprep.subr.bf16.mxu1 %v2545_v19  ;;  %1915 = vmatprep.subr.bf16.mxu0 %v2536_v45  ;;  %v526_v42 = vsub.f32 %v3268_v23, %v525_v41  ;;  %v520_v46 = vsub.f32 %v3269_v50, %v519_v63  ;;  %v2630_v32 = vpack.c.bf16 %v503_v30, %v491_v12  ;;  %v549_v8 = vand.u32 4294901760, %v3272_v54 }
  0x7f   :  { %v515_v19 = vand.u32 4294901760, %v514_v39  ;;  %v532_v45 = vsub.f32 %v3270_v15, %v531_v60  ;;  %v538_v55 = vsub.f32 %v3271_v52, %v537_v9  ;;  %v2636_v51 = vpack.c.bf16 %v509_v58, %v497_v21  ;;  %v3274_v39 = vld [vmem:[#allocation46_spill] sm:$0xff]  ;;  %v3275_v52 = vld [vmem:[#allocation48_spill] sm:$0xff] }
  0x80   :  { %v527_v2 = vand.u32 4294901760, %v526_v42  ;;  %v543_v23 = vand.u32 4294901760, %v3273_v14  ;;  %v521_v12 = vand.u32 4294901760, %v520_v46  ;;  %v555_v15 = vand.u32 4294901760, %v3274_v39 }
  0x81   :  { %1737 = vmatpush1.bf16.msra.mxu1 %v2560_v20  ;;  %1917 = vmatpush1.bf16.msra.mxu0 %v2538_v47  ;;  %v533_v30 = vand.u32 4294901760, %v532_v45  ;;  %v561_v50 = vand.u32 4294901760, %v3275_v52  ;;  %v2644_v20 = vpack.c.bf16 %v525_v41, %v513_v1  ;;  %v2646_v47 = vpack.c.bf16 %v531_v60, %v519_v63  ;;  %v3276_v41 = vld [vmem:[#allocation49_spill] sm:$0xff]  ;;  %v3277_v60 = vld [vmem:[#allocation51_spill] sm:$0xff] }
  0x82   :  { %1739 = vmatprep.subr.bf16.mxu1 %v2572_v31  ;;  %1919 = vmatprep.subr.bf16.mxu0 %v2554_v18  ;;  %v550_v21 = vsub.f32 %v3272_v54, %v549_v8  ;;  %v544_v58 = vsub.f32 %v3273_v14, %v543_v23  ;;  %v2650_v42 = vpack.c.bf16 %v527_v2, %v515_v19  ;;  %v539_v61 = vand.u32 4294901760, %v538_v55  ;;  %v3278_v2 = vld [vmem:[#allocation52_spill] sm:$0xff] }
  0x83   :  { %v556_v31 = vsub.f32 %v3274_v39, %v555_v15  ;;  %v562_v18 = vsub.f32 %v3275_v52, %v561_v50  ;;  %v2656_v1 = vpack.c.bf16 %v549_v8, %v537_v9  ;;  %v573_v63 = vand.u32 4294901760, %v3276_v41 }
  0x84   :  { %v551_v46 = vand.u32 4294901760, %v550_v21  ;;  %v567_v45 = vand.u32 4294901760, %v3277_v60  ;;  %v2662_v19 = vpack.c.bf16 %v533_v30, %v521_v12  ;;  %v2664_v55 = vpack.c.bf16 %v555_v15, %v543_v23  ;;  %v3280_v12 = vld [vmem:[#allocation55_spill] sm:$0xff] }
  0x85   :  { %1741 = vmatpush1.bf16.msra.mxu1 %v2583_v24  ;;  %1921 = vmatpush1.bf16.msra.mxu0 %v2567_v56  ;;  %v579_v52 = vand.u32 4294901760, %v3278_v2  ;;  %v3279_v24 = vld [vmem:[#allocation54_spill] sm:$0xff]  ;;  %v545_v56 = vand.u32 4294901760, %v544_v58  ;;  %v557_v21 = vand.u32 4294901760, %v556_v31  ;;  %v574_v9 = vsub.f32 %v3276_v41, %v573_v63  ;;  %v3281_v58 = vld [vmem:[#allocation57_spill] sm:$0xff] }
  0x86   :  { %1743 = vmatprep.subr.bf16.mxu1 %v2585_v0  ;;  %1923 = vmatprep.subr.bf16.mxu0 %v2577_v38  ;;  %v585_v39 = vand.u32 4294901760, %v3279_v24  ;;  %v568_v8 = vsub.f32 %v3277_v60, %v567_v45  ;;  %v2670_v14 = vpack.c.bf16 %v551_v46, %v539_v61  ;;  %v563_v54 = vand.u32 4294901760, %v562_v18  ;;  %v3282_v46 = vld [vmem:[#allocation58_spill] sm:$0xff]  ;;  %v3283_v60 = vld [vmem:[#allocation59_spill] sm:$0xff] }
  0x87   :  { %v580_v0 = vsub.f32 %v3278_v2, %v579_v52  ;;  %v575_v23 = vand.u32 4294901760, %v574_v9  ;;  %v2676_v15 = vpack.c.bf16 %v573_v63, %v561_v50  ;;  %v597_v30 = vand.u32 4294901760, %v3280_v12  ;;  %v57_v63 = vld [vmem:[#allocation5 + $0x18] sm:$0xff] }
  0x88   :  { %v586_v38 = vsub.f32 %v3279_v24, %v585_v39  ;;  %v591_v31 = vand.u32 4294901760, %v3281_v58  ;;  %v569_v61 = vand.u32 4294901760, %v568_v8  ;;  %v603_v2 = vand.u32 4294901760, %v3282_v46 }
  0x89   :  { %1745 = vmatpush1.bf16.msra.mxu1 %v2594_v17  ;;  %1925 = vmatpush1.bf16.msra.mxu0 %v2579_v25  ;;  %v581_v18 = vand.u32 4294901760, %v580_v0  ;;  %v609_v24 = vand.u32 4294901760, %v3283_v60  ;;  %v2683_v41 = vpack.c.bf16 %v557_v21, %v545_v56  ;;  %v2685_v17 = vpack.c.bf16 %v579_v52, %v567_v45  ;;  %v3284_v52 = vld [vmem:[#allocation61_spill] sm:$0xff]  ;;  %v3285_v0 = vld [vmem:[#allocation63_spill] sm:$0xff] }
  0x8a   :  { %1747 = vmatprep.subr.bf16.mxu1 %v1746_v6  ;;  %1927 = vmatprep.subr.bf16.mxu0 %v2601_v5  ;;  %v598_v50 = vsub.f32 %v3280_v12, %v597_v30  ;;  %v592_v25 = vsub.f32 %v3281_v58, %v591_v31  ;;  %v2689_v9 = vpack.c.bf16 %v575_v23, %v563_v54  ;;  %v587_v6 = vand.u32 4294901760, %v586_v38  ;;  %v3286_v23 = vld [vmem:[#allocation64_spill] sm:$0xff] }
  0x8b   :  { %v604_v5 = vsub.f32 %v3282_v46, %v603_v2  ;;  %v610_v8 = vsub.f32 %v3283_v60, %v609_v24  ;;  %v2695_v21 = vpack.c.bf16 %v597_v30, %v585_v39  ;;  %v621_v45 = vand.u32 4294901760, %v3284_v52  ;;  %v56_v46 = vld [vmem:[#allocation5 + $0x10] sm:$0xff] }
  0x8c   :  { %v599_v56 = vand.u32 4294901760, %v598_v50  ;;  %v615_v12 = vand.u32 4294901760, %v3285_v0  ;;  %v2701_v54 = vpack.c.bf16 %v581_v18, %v569_v61  ;;  %v2703_v38 = vpack.c.bf16 %v603_v2, %v591_v31 }
  0x8d   :  { %1749 = vmatpush1.bf16.msra.mxu1 %v2624_v53  ;;  %1929 = vmatpush1.bf16.msra.mxu0 %v2603_v33  ;;  %v627_v60 = vand.u32 4294901760, %v3286_v23  ;;  %v79_v53 = vmul.f32 %v2471_v36, %v57_v63  ;;  %v593_v33 = vand.u32 4294901760, %v592_v25  ;;  %v605_v50 = vand.u32 4294901760, %v604_v5  ;;  %v3288_v25 = vld [vmem:[#allocation65_spill] sm:$0xff]  ;;  %v3289_v5 = vld [vmem:[#allocation67_spill] sm:$0xff] }
  0x8e   :  { %1751 = vmatprep.subr.bf16.mxu1 %v2630_v32  ;;  %1931 = vmatprep.subr.bf16.mxu0 %v2612_v29  ;;  %v622_v39 = vsub.f32 %v3284_v52, %v621_v45  ;;  %v616_v30 = vsub.f32 %v3285_v0, %v615_v12  ;;  %v2709_v58 = vpack.c.bf16 %v599_v56, %v587_v6  ;;  %v611_v32 = vand.u32 4294901760, %v610_v8  ;;  %v59_v0 = vld [vmem:[#allocation5 + $0x28] sm:$0xff] }
  0x8f   :  { %v628_v29 = vsub.f32 %v3286_v23, %v627_v60  ;;  %v151_v61 = vsel %vm146_vm0, %v79_v53, 0  ;;  %v633_v63 = vand.u32 4294901760, %v3288_v25  ;;  %v645_v8 = vand.u32 4294901760, %v3289_v5 }
  0x90   :  { %v623_v2 = vand.u32 4294901760, %v622_v39  ;;  %v617_v31 = vand.u32 4294901760, %v616_v30  ;;  %v2715_v18 = vand.u32 4294901760, %v151_v61  ;;  %v78_v56 = vmul.f32 %v2452_v59, %v56_v46  ;;  %v3291_v30 = vld [vmem:[#allocation69_spill] sm:$0xff] }
  0x91   :  { %1753 = vmatpush1.bf16.msra.mxu1 %v2636_v51  ;;  %1933 = vmatpush1.bf16.msra.mxu0 %v2626_v7  ;;  %v629_v6 = vand.u32 4294901760, %v628_v29  ;;  %v639_v53 = vand.u32 4294901760, %v2422_v22  ;;  %v2723_v51 = vpack.c.bf16 %v621_v45, %v609_v24  ;;  %v634_v39 = vsub.f32 %v3288_v25, %v633_v63 }
  0x92   :  { %3287 = vst [vmem:[#allocation86_spill] sm:$0xff] %v2715_v18  ;;  %1755 = vmatprep.subr.bf16.mxu1 %v2650_v42  ;;  %1935 = vmatprep.subr.bf16.mxu0 %v2644_v20  ;;  %v2726_v7 = vsub.f32 %v151_v61, %v2715_v18  ;;  %v651_v23 = vand.u32 4294901760, %v3291_v30  ;;  %v2730_v42 = vpack.c.bf16 %v605_v50, %v593_v33  ;;  %v2735_v52 = vand.u32 4294901760, %v78_v56 }
  0x93   :  { %v2732_v20 = vpack.c.bf16 %v627_v60, %v615_v12  ;;  %v646_v29 = vsub.f32 %v3289_v5, %v645_v8  ;;  %v2739_v24 = vpack.c.bf16 %v623_v2, %v611_v32  ;;  %v640_v45 = vsub.f32 %v2422_v22, %v639_v53  ;;  %v3293_v2 = vld [vmem:[#allocation71_spill] sm:$0xff] }
  0x94   :  { %3290 = vst [vmem:[#allocation65_spill] sm:$0xff] %v2726_v7  ;;  %v304_v46 = vand.u32 4294901760, %v2726_v7  ;;  %v652_v61 = vsub.f32 %v3291_v30, %v651_v23  ;;  %v2746_v60 = vpack.c.bf16 %v629_v6, %v617_v31  ;;  %v635_v12 = vand.u32 4294901760, %v634_v39  ;;  %v3294_v31 = vld [vmem:[#allocation72_spill] sm:$0xff] }
  0x95   :  { %1757 = vmatpush1.bf16.msra.mxu1 %v2662_v19  ;;  %1937 = vmatpush1.bf16.msra.mxu0 %v2646_v47  ;;  %v2749_v33 = vsub.f32 %v78_v56, %v2735_v52  ;;  %v81_v47 = vmul.f32 %v2471_v36, %v59_v0  ;;  %v647_v50 = vand.u32 4294901760, %v646_v29  ;;  %v641_v32 = vand.u32 4294901760, %v640_v45  ;;  %v58_v39 = vld [vmem:[#allocation5 + $0x20] sm:$0xff]  ;;  %v61_v45 = vld [vmem:[#allocation5 + $0x38] sm:$0xff] }
  0x96   :  { %1759 = vmatprep.subr.bf16.mxu1 %v2670_v14  ;;  %1939 = vmatprep.subr.bf16.mxu0 %v2656_v1  ;;  %v305_v19 = vsub.f32 %v2726_v7, %v304_v46  ;;  %v657_v18 = vand.u32 4294901760, %v3293_v2  ;;  %v653_v14 = vand.u32 4294901760, %v652_v61  ;;  %v669_v6 = vand.u32 4294901760, %v3294_v31 }
  0x97   :  { %3292 = vst [vmem:[#allocation67_spill] sm:$0xff] %v2749_v33  ;;  %1146 = vmatprep.mubr.f32.mxu0 %v304_v46  ;;  %v310_v30 = vand.u32 4294901760, %v2749_v33  ;;  %v154_v1 = vsel %vm146_vm0, %v81_v47, 0  ;;  %v2759_v56 = vpack.c.bf16 %v645_v8, %v633_v63  ;;  %v2767_v47 = vpack.c.bf16 %v651_v23, %v639_v53 }
  0x98   :  { %v306_v0 = vand.u32 4294901760, %v305_v19  ;;  %v2761_v29 = vand.u32 4294901760, %v154_v1  ;;  %v658_v46 = vsub.f32 %v3293_v2, %v657_v18  ;;  %v1774_v63 = vpack.c.bf16 %v647_v50, %v635_v12 }
  0x99   :  { %1761 = vmatpush1.bf16.msra.mxu1 %v2683_v41  ;;  %1941 = vmatpush1.bf16.msra.mxu0 %v2664_v55  ;;  %v311_v61 = vsub.f32 %v2749_v33, %v310_v30  ;;  %v670_v41 = vsub.f32 %v3294_v31, %v669_v6  ;;  %v663_v55 = vand.u32 4294901760, %v2438_v43  ;;  %v80_v19 = vmul.f32 %v2452_v59, %v58_v39 }
  0x9a   :  { %1763 = vmatprep.subr.bf16.mxu1 %v2689_v9  ;;  %1943 = vmatprep.subr.bf16.mxu0 %v2676_v15  ;;  %v2772_v8 = vsub.f32 %v154_v1, %v2761_v29  ;;  %v675_v9 = vand.u32 4294901760, %v2440_v40  ;;  %v2776_v15 = vpack.c.bf16 %v653_v14, %v641_v32  ;;  %v2778_v33 = vpack.c.bf16 %v669_v6, %v657_v18  ;;  %v60_v1 = vld [vmem:[#allocation5 + $0x30] sm:$0xff] }
  0x9b   :  { %307 = vmatprep.mubr.f32.mxu1 %v306_v0  ;;  %1150 = vmatmul.mubr.f32.gmra.mrb[2].mxu0 %v310_v30  ;;  %v312_v7 = vand.u32 4294901760, %v311_v61  ;;  %v83_v23 = vmul.f32 %v2471_v36, %v61_v45  ;;  %v659_v30 = vand.u32 4294901760, %v658_v46  ;;  %v671_v12 = vand.u32 4294901760, %v670_v41 }
  0x9c   :  { %3295 = vst [vmem:[#allocation71_spill] sm:$0xff] %v2772_v8  ;;  %v320_v53 = vand.u32 4294901760, %v2772_v8  ;;  %v2784_v50 = vand.u32 4294901760, %v80_v19  ;;  %v664_v18 = vsub.f32 %v2438_v43, %v663_v55  ;;  %v676_v32 = vsub.f32 %v2440_v40, %v675_v9 }
  0x9d   :  { %1765 = vmatpush1.bf16.msra.mxu1 %v2701_v54  ;;  %1945 = vmatpush1.bf16.msra.mxu0 %v2685_v17  ;;  %v157_v14 = vsel %vm146_vm0, %v83_v23, 0  ;;  %v681_v54 = vand.u32 4294901760, %v2444_v57  ;;  %v2796_v39 = vpack.c.bf16 %v675_v9, %v663_v55  ;;  %v693_v0 = vand.u32 4294901760, %v2446_v62 }
  0x9e   :  { %1767 = vmatprep.subr.bf16.mxu1 %v2709_v58  ;;  %1947 = vmatprep.subr.bf16.mxu0 %v2695_v21  ;;  %v321_v17 = vsub.f32 %v2772_v8, %v320_v53  ;;  %v2794_v6 = vsub.f32 %v80_v19, %v2784_v50  ;;  %v2798_v58 = vand.u32 4294901760, %v157_v14  ;;  %v82_v46 = vmul.f32 %v2452_v59, %v60_v1  ;;  %v63_v19 = vld [vmem:[#allocation5 + $0x48] sm:$0xff] }
  0x9f   :  { %313 = vmatmul.mubr.f32.gmra.mrb[2].mxu1 %v312_v7  ;;  %1158 = vmatprep.mubr.f32.mxu0 %v320_v53  ;;  %v682_v21 = vsub.f32 %v2444_v57, %v681_v54  ;;  %v687_v45 = vand.u32 4294901760, %v2448_v26  ;;  %v1778_v61 = vpack.c.bf16 %v671_v12, %v659_v30  ;;  %v665_v9 = vand.u32 4294901760, %v664_v18  ;;  %v3300_v12 = vld [vmem:[#allocation76_spill] sm:$0xff]  ;;  %v3302_v18 = vld [vmem:[#allocation77_spill] sm:$0xff] }
  0xa0   :  { %3296 = vst [vmem:[#allocation72_spill] sm:$0xff] %v2794_v6  ;;  %3297 = vst [vmem:[#allocation87_spill] sm:$0xff] %v2798_v58  ;;  %v322_v7 = vand.u32 4294901760, %v321_v17  ;;  %v326_v41 = vand.u32 4294901760, %v2794_v6  ;;  %v2808_v55 = vsub.f32 %v157_v14, %v2798_v58  ;;  %v677_v23 = vand.u32 4294901760, %v676_v32  ;;  %v62_v58 = vld [vmem:[#allocation5 + $0x40] sm:$0xff] }
  0xa1   :  { %1769 = vmatpush1.bf16.msra.mxu1 %v2730_v42  ;;  %1949 = vmatpush1.bf16.msra.mxu0 %v2703_v38  ;;  %v694_v53 = vsub.f32 %v2446_v62, %v693_v0  ;;  %v2813_v1 = vand.u32 4294901760, %v82_v46  ;;  %v688_v30 = vsub.f32 %v2448_v26, %v687_v45  ;;  %v699_v14 = vand.u32 4294901760, %v3300_v12 }
  0xa2   :  { %3298 = vst [vmem:[#allocation88_spill] sm:$0xff] %v2808_v55  ;;  %1771 = vmatprep.subr.bf16.mxu1 %v2739_v24  ;;  %1951 = vmatprep.subr.bf16.mxu0 %v2723_v51  ;;  %v327_v38 = vsub.f32 %v2794_v6, %v326_v41  ;;  %v336_v42 = vand.u32 4294901760, %v2808_v55  ;;  %v683_v17 = vand.u32 4294901760, %v682_v21  ;;  %v85_v51 = vmul.f32 %v2471_v36, %v63_v19 }
  0xa3   :  { %3299 = vst [vmem:[#allocation89_spill] sm:$0xff] %v2813_v1  ;;  %323 = vmatprep.mubr.f32.mxu1 %v322_v7  ;;  %1162 = vmatmul.mubr.f32.gmra.mrb[4].mxu0 %v326_v41  ;;  %v2820_v24 = vsub.f32 %v82_v46, %v2813_v1  ;;  %v705_v32 = vand.u32 4294901760, %v3302_v18  ;;  %v695_v6 = vand.u32 4294901760, %v694_v53  ;;  %v700_v8 = vsub.f32 %v3300_v12, %v699_v14 }
  0xa4   :  { %v328_v7 = vand.u32 4294901760, %v327_v38  ;;  %v337_v41 = vsub.f32 %v2808_v55, %v336_v42  ;;  %v1780_v21 = vpack.c.bf16 %v677_v23, %v665_v9  ;;  %v689_v36 = vand.u32 4294901760, %v688_v30  ;;  %1170 = vmatprep.mubr.f32.mxu0 %v336_v42  ;;  %v3304_v9 = vld [vmem:[#allocation81_spill] sm:$0xff] }
  0xa5   :  { %3301 = vst [vmem:[#allocation76_spill] sm:$0xff] %v2820_v24  ;;  %1773 = vmatpush1.bf16.msra.mxu1 %v2746_v60  ;;  %1953 = vmatpush1.bf16.msra.mxu0 %v2732_v20  ;;  %v342_v46 = vand.u32 4294901760, %v2820_v24  ;;  %v160_v19 = vsel %vm146_vm0, %v85_v51, 0  ;;  %v701_v20 = vand.u32 4294901760, %v700_v8  ;;  %v706_v53 = vsub.f32 %v3302_v18, %v705_v32 }
  0xa6   :  { %1775 = vmatprep.subr.bf16.mxu1 %v1774_v63  ;;  %1955 = vmatprep.subr.bf16.mxu0 %v2759_v56  ;;  %v338_v60 = vand.u32 4294901760, %v337_v41  ;;  %v2831_v38 = vand.u32 4294901760, %v160_v19  ;;  %v3303_v63 = vld [vmem:[#allocation79_spill] sm:$0xff]  ;;  %v84_v56 = vmul.f32 %v2452_v59, %v62_v58  ;;  %v711_v23 = vand.u32 4294901760, %v3304_v9 }
  0xa7   :  { %329 = vmatmul.mubr.f32.gmra.mrb[4].mxu1 %v328_v7  ;;  %v343_v55 = vsub.f32 %v2820_v24, %v342_v46  ;;  %1174 = vmatmul.mubr.f32.gmra.mrb[6].mxu0 %v342_v46  ;;  %v717_v1 = vand.u32 4294901760, %v3303_v63  ;;  %v1782_v30 = vpack.c.bf16 %v695_v6, %v683_v17  ;;  %v1962_v42 = vpack.c.bf16 %v693_v0, %v681_v54  ;;  %v3338_v24 = vld [vmem:[#allocation21_spill] sm:$0xff] }
  0xa8   :  { %v2841_v8 = vsub.f32 %v160_v19, %v2831_v38  ;;  %v723_v51 = vand.u32 4294901760, %v2493_v28  ;;  %v707_v41 = vand.u32 4294901760, %v706_v53  ;;  %v2846_v58 = vand.u32 4294901760, %v84_v56  ;;  %339 = vmatprep.mubr.f32.mxu1 %v338_v60  ;;  %v3307_v53 = vld [vmem:[#allocation13_spill] sm:$0xff] }
  0xa9   :  { %1777 = vmatpush1.bf16.msra.mxu1 %v2776_v15  ;;  %1957 = vmatpush1.bf16.msra.mxu0 %v2767_v47  ;;  %v344_v7 = vand.u32 4294901760, %v343_v55  ;;  %v718_v59 = vsub.f32 %v3303_v63, %v717_v1  ;;  %v1964_v15 = vpack.c.bf16 %v699_v14, %v687_v45  ;;  %v712_v54 = vsub.f32 %v3304_v9, %v711_v23 }
  0xaa   :  { %3305 = vst [vmem:[#allocation79_spill] sm:$0xff] %v2841_v8  ;;  %1779 = vmatprep.subr.bf16.mxu1 %v1778_v61  ;;  %1959 = vmatprep.subr.bf16.mxu0 %v2778_v33  ;;  %v352_v47 = vand.u32 4294901760, %v2841_v8  ;;  %v724_v6 = vsub.f32 %v2493_v28, %v723_v51  ;;  %v1784_v0 = vpack.c.bf16 %v701_v20, %v689_v36  ;;  %v3308_v36 = vld [vmem:[#allocation14_spill] sm:$0xff] }
  0xab   :  { %345 = vmatmul.mubr.f32.gmra.mrb[6].mxu1 %v344_v7  ;;  %v719_v17 = vand.u32 4294901760, %v718_v59  ;;  %v1966_v61 = vpack.c.bf16 %v717_v1, %v705_v32  ;;  %v2852_v33 = vsub.f32 %v84_v56, %v2846_v58  ;;  %v713_v46 = vand.u32 4294901760, %v712_v54  ;;  %v3309_v1 = vld [vmem:[#allocation17_spill] sm:$0xff]  ;;  %v3310_v32 = vld [vmem:[#allocation18_spill] sm:$0xff] }
  0xac   :  { %v353_v55 = vsub.f32 %v2841_v8, %v352_v47  ;;  %v725_v45 = vand.u32 4294901760, %v724_v6  ;;  %v1968_v14 = vpack.c.bf16 %v723_v51, %v711_v23  ;;  %v1790_v20 = vpack.c.bf16 %v3308_v36, %v3307_v53  ;;  %1182 = vmatprep.mubr.f32.mxu0 %v352_v47  ;;  %v3313_v59 = vld [vmem:[#allocation37_spill] sm:$0xff]  ;;  %v3314_v6 = vld [vmem:[#allocation39_spill] sm:$0xff]  ;;  %v3324_v47 = vld [vmem:[#allocation52_spill] sm:$0xff] }
  0xad   :  { %3306 = vst [vmem:[#allocation81_spill] sm:$0xff] %v2852_v33  ;;  %1781 = vmatpush1.bf16.msra.mxu1 %v1780_v21  ;;  %1961 = vmatpush1.bf16.msra.mxu0 %v2796_v39  ;;  %v1786_v19 = vpack.c.bf16 %v719_v17, %v707_v41  ;;  %v358_v60 = vand.u32 4294901760, %v2852_v33  ;;  %v1792_v56 = vpack.c.bf16 %v3310_v32, %v3309_v1  ;;  %v3315_v17 = vld [vmem:[#allocation40_spill] sm:$0xff]  ;;  %v3320_v36 = vld [vmem:[#allocation83_spill] sm:$0xff]  ;;  %v3322_v32 = vld [vmem:[#allocation49_spill] sm:$0xff] }
  0xae   :  { %1783 = vmatprep.subr.bf16.mxu1 %v1782_v30  ;;  %1963 = vmatprep.subr.bf16.mxu0 %v1962_v42  ;;  %v354_v7 = vand.u32 4294901760, %v353_v55  ;;  %v1788_v21 = vpack.c.bf16 %v725_v45, %v713_v46  ;;  %v1794_v39 = vpack.c.bf16 %v2276_v44, %v2271_v37  ;;  %v1802_v23 = vpack.c.bf16 %v2302_v4, %v2300_v3  ;;  %v3311_v44 = vld [vmem:[#allocation34_spill] sm:$0xff]  ;;  %v3312_v4 = vld [vmem:[#allocation36_spill] sm:$0xff]  ;;  %v3317_v45 = vld [vmem:[#allocation43_spill] sm:$0xff] }
  0xaf   :  { %v359_v30 = vsub.f32 %v2852_v33, %v358_v60  ;;  %1186 = vmatmul.mubr.f32.gmra.mrb[8].mxu0 %v358_v60  ;;  %v3316_v46 = vld [vmem:[#allocation42_spill] sm:$0xff]  ;;  %v3321_v1 = vld [vmem:[#allocation48_spill] sm:$0xff]  ;;  %v3323_v37 = vld [vmem:[#allocation51_spill] sm:$0xff] }
  0xb0   :  { %355 = vmatprep.mubr.f32.mxu1 %v354_v7  ;;  %1437 = vmatprep.mubr.f32.mxu0 %v3320_v36  ;;  %v3327_v55 = vld [vmem:[#allocation57_spill] sm:$0xff]  ;;  %v3328_v51 = vld [vmem:[#allocation58_spill] sm:$0xff]  ;;  %v3329_v60 = vld [vmem:[#allocation59_spill] sm:$0xff] }
  0xb1   :  { %1785 = vmatpush1.bf16.msra.mxu1 %v1784_v0  ;;  %1965 = vmatpush1.bf16.msra.mxu0 %v1964_v15  ;;  %v360_v54 = vand.u32 4294901760, %v359_v30  ;;  %v3319_v15 = vld [vmem:[#allocation46_spill] sm:$0xff]  ;;  %v3326_v30 = vld [vmem:[#allocation55_spill] sm:$0xff]  ;;  %v3330_v33 = vld [vmem:[#allocation61_spill] sm:$0xff] }
  0xb2   :  { %1787 = vmatprep.subr.bf16.mxu1 %v1786_v19  ;;  %1967 = vmatprep.subr.bf16.mxu0 %v1966_v61  ;;  %v3325_v19 = vld [vmem:[#allocation54_spill] sm:$0xff]  ;;  %v3331_v53 = vld [vmem:[#allocation63_spill] sm:$0xff]  ;;  %v3332_v61 = vld [vmem:[#allocation64_spill] sm:$0xff] }
  0xb3   :  { %361 = vmatmul.mubr.f32.gmra.mrb[8].mxu1 %v360_v54  ;;  %v3333_v7 = vld [vmem:[#allocation69_spill] sm:$0xff]  ;;  %v3335_v3 = vld [vmem:[#allocation82_spill] sm:$0xff]  ;;  %v3337_v42 = vld [vmem:[#allocation20_spill] sm:$0xff] }
  0xb4   :  { %732 = vmatprep.mubr.f32.mxu1 %v3320_v36  ;;  %v1796_v8 = vpack.c.bf16 %v3338_v24, %v3337_v42  ;;  %v3339_v0 = vld [vmem:[#allocation16_spill] sm:$0xff]  ;;  %v3340_v41 = vld [vmem:[#allocation23_spill] sm:$0xff]  ;;  %v3347_v42 = vld [vmem:[#allocation25_spill] sm:$0xff] }
  0xb5   :  { %1789 = vmatpush1.bf16.msra.mxu1 %v1788_v21  ;;  %1969 = vmatpush1.bf16.msra.mxu0 %v1968_v14  ;;  %v3334_v21 = vld [vmem:[#allocation12_spill] sm:$0xff]  ;;  %v3345_v54 = vld [vmem:[#allocation27_spill] sm:$0xff] }
  0xb6   :  { %1791 = vmatprep.subr.bf16.mxu1 %v1790_v20  ;;  %1971 = vmatprep.subr.bf16.mxu0 %v3334_v21  ;;  %v3336_v20 = vld [vmem:[#allocation15_spill] sm:$0xff]  ;;  %v3341_v14 = vld [vmem:[#allocation24_spill] sm:$0xff]  ;;  %v3342_v21 = vld [vmem:[#allocation86_spill] sm:$0xff] }
  0xb7   :  { %v1798_v18 = vpack.c.bf16 %v3341_v14, %v3340_v41  ;;  %v3349_v41 = vld [vmem:[#allocation87_spill] sm:$0xff]  ;;  %v3353_v14 = vpack.c.bf16 %v2316_v16, %v2312_v13  ;;  %v3357_v13 = vpack.c.bf16 %v2330_v48, %v2326_v35  ;;  %v3358_v16 = vld [vmem:[#allocation32_spill] sm:$0xff]  ;;  %v3364_v35 = vpack.c.bf16 %v3315_v17, %v3314_v6  ;;  %v3365_v48 = vld [vmem:[#allocation38_spill] sm:$0xff] }
  0xb8   :  { %734 = vmatmul.mubr.f32.vlgmr.msra.gmra.mrb[0].mxu1 %v3335_v3  ;;  %1439 = vmatmul.mubr.f32.vlgmr.msra.gmra.mrb[0].mxu0 %v3335_v3  ;;  %v3372_v6 = vld [vmem:[#allocation47_spill] sm:$0xff]  ;;  %v3373_v17 = vpack.c.bf16 %v3324_v47, %v3323_v37  ;;  %v3380_v37 = vld [vmem:[#allocation60_spill] sm:$0xff]  ;;  %v3381_v47 = vpack.c.bf16 %v3332_v61, %v3331_v53  ;;  %v3388_v53 = vld [vmem:[#allocation70_spill] sm:$0xff]  ;;  %v3389_v61 = vpack.c.bf16 %v2440_v40, %v2438_v43 }
  0xb9   :  { %1793 = vmatpush1.bf16.msra.mxu1 %v1792_v56  ;;  %1973 = vmatpush1.bf16.msra.mxu0 %v3336_v20  ;;  %v3343_v56 = vld [vmem:[#allocation19_spill] sm:$0xff]  ;;  %v3344_v20 = vld [vmem:[#allocation26_spill] sm:$0xff]  ;;  %v3398_v40 = vpack.c.bf16 %v2493_v28, %v3304_v9  ;;  %v3404_v28 = vld [vmem:[#allocation72_spill] sm:$0xff] }
  0xba   :  { %1795 = vmatprep.subr.bf16.mxu1 %v1794_v39  ;;  %1975 = vmatprep.subr.bf16.mxu0 %v3339_v0  ;;  %v1800_v24 = vpack.c.bf16 %v3345_v54, %v3344_v20  ;;  %v3346_v39 = vld [vmem:[#allocation22_spill] sm:$0xff]  ;;  %v3351_v0 = vpack.c.bf16 %v2308_v11, %v2306_v10  ;;  %v3352_v54 = vld [vmem:[#allocation29_spill] sm:$0xff]  ;;  %v3355_v10 = vpack.c.bf16 %v2324_v34, %v2322_v27  ;;  %v3356_v11 = vld [vmem:[#allocation31_spill] sm:$0xff] }
  0xbb   :  { %740 = vmatprep.mubr.f32.mxu1 %v3342_v21  ;;  %1445 = vmatprep.mubr.f32.mxu0 %v3342_v21  ;;  %v3360_v20 = vpack.c.bf16 %v3311_v44, %v2334_v49  ;;  %v3362_v27 = vpack.c.bf16 %v3313_v59, %v3312_v4  ;;  %v3363_v34 = vld [vmem:[#allocation35_spill] sm:$0xff]  ;;  %v3367_v49 = vld [vmem:[#allocation41_spill] sm:$0xff]  ;;  %v3370_v4 = vld [vmem:[#allocation44_spill] sm:$0xff]  ;;  %v3371_v59 = vpack.c.bf16 %v3322_v32, %v3321_v1 }
  0xbc   :  { %742 = vmatmul.mubr.f32.gmra.mrb[2].mxu1 %v2735_v52  ;;  %1447 = vmatmul.mubr.f32.gmra.mrb[2].mxu0 %v2735_v52  ;;  %v3368_v44 = vld [vmem:[#allocation45_spill] sm:$0xff]  ;;  %v3378_v1 = vld [vmem:[#allocation56_spill] sm:$0xff]  ;;  %v3379_v32 = vpack.c.bf16 %v3330_v33, %v3329_v60  ;;  %v3387_v60 = vpack.c.bf16 %v3294_v31, %v3293_v2  ;;  %v3394_v2 = vld [vmem:[#allocation75_spill] sm:$0xff] }
  0xbd   :  { %1797 = vmatpush1.bf16.msra.mxu1 %v1796_v8  ;;  %1977 = vmatpush1.bf16.msra.mxu0 %v3343_v56  ;;  %v3348_v8 = vld [vmem:[#allocation28_spill] sm:$0xff]  ;;  %v3359_v56 = vld [vmem:[#allocation85_spill] sm:$0xff]  ;;  %v3397_v43 = vld [vmem:[#allocation78_spill] sm:$0xff] }
  0xbe   :  { %1799 = vmatprep.subr.bf16.mxu1 %v1798_v18  ;;  %1979 = vmatprep.subr.bf16.mxu0 %v3346_v39  ;;  %v3350_v18 = vld [vmem:[#allocation89_spill] sm:$0xff]  ;;  %v3369_v39 = vpack.c.bf16 %v3319_v15, %v3368_v44  ;;  %v3386_v33 = vld [vmem:[#allocation68_spill] sm:$0xff] }
  0xbf   :  { %748 = vmatprep.mubr.f32.mxu1 %v2761_v29  ;;  %1453 = vmatprep.mubr.f32.mxu0 %v2761_v29  ;;  %v3376_v15 = vld [vmem:[#allocation53_spill] sm:$0xff]  ;;  %v3405_v9 = vld [vmem:[#allocation88_spill] sm:$0xff] }
  0xc0   :  { %750 = vmatmul.mubr.f32.gmra.mrb[4].mxu1 %v2784_v50  ;;  %1455 = vmatmul.mubr.f32.gmra.mrb[4].mxu0 %v2784_v50  ;;  %v3395_v31 = vld [vmem:[#allocation77_spill] sm:$0xff] }
  0xc1   :  { %1801 = vmatpush1.bf16.msra.mxu1 %v1800_v24  ;;  %1981 = vmatpush1.bf16.msra.mxu0 %v3347_v42  ;;  %v3361_v24 = vld [vmem:[#allocation33_spill] sm:$0xff]  ;;  %v3377_v42 = vpack.c.bf16 %v3328_v51, %v3327_v55  ;;  %v3384_v51 = vld [vmem:[#allocation66_spill] sm:$0xff]  ;;  %v3385_v55 = vpack.c.bf16 %v3333_v7, %v2422_v22  ;;  %v3393_v7 = vpack.c.bf16 %v3300_v12, %v2448_v26  ;;  %v3402_v12 = vld [vmem:[#allocation67_spill] sm:$0xff] }
  0xc2   :  { %1803 = vmatprep.subr.bf16.mxu1 %v1802_v23  ;;  %1983 = vmatprep.subr.bf16.mxu0 %v3348_v8  ;;  %v3354_v23 = vld [vmem:[#allocation30_spill] sm:$0xff]  ;;  %v3396_v8 = vpack.c.bf16 %v3303_v63, %v3395_v31  ;;  %v3401_v26 = vld [vmem:[#allocation65_spill] sm:$0xff]  ;;  %v3403_v63 = vld [vmem:[#allocation71_spill] sm:$0xff] }
  0xc3   :  { %756 = vmatprep.mubr.f32.mxu1 %v3349_v41  ;;  %1461 = vmatprep.mubr.f32.mxu0 %v3349_v41  ;;  %v3392_v22 = vld [vmem:[#allocation74_spill] sm:$0xff] }
  0xc4   :  { %758 = vmatmul.mubr.f32.gmra.mrb[6].mxu1 %v3350_v18  ;;  %1463 = vmatmul.mubr.f32.gmra.mrb[6].mxu0 %v3350_v18 }
  0xc5   :  { %1805 = vmatpush1.bf16.msra.mxu1 %v3351_v0  ;;  %1985 = vmatpush1.bf16.msra.mxu0 %v3352_v54 }
  0xc6   :  { %1807 = vmatprep.subr.bf16.mxu1 %v3353_v14  ;;  %1987 = vmatprep.subr.bf16.mxu0 %v3354_v23 }
  0xc7   :  { %764 = vmatprep.mubr.f32.mxu1 %v2831_v38  ;;  %1469 = vmatprep.mubr.f32.mxu0 %v2831_v38 }
  0xc8   :  { %766 = vmatmul.mubr.f32.gmra.mrb[8].mxu1 %v2846_v58  ;;  %1471 = vmatmul.mubr.f32.gmra.mrb[8].mxu0 %v2846_v58 }
  0xc9   :  { %1809 = vmatpush1.bf16.msra.mxu1 %v3355_v10  ;;  %1989 = vmatpush1.bf16.msra.mxu0 %v3356_v11 }
  0xca   :  { %1811 = vmatprep.subr.bf16.mxu1 %v3357_v13  ;;  %1991 = vmatprep.subr.bf16.mxu0 %v3358_v16 }
  0xcb   :  { %958 = vmatprep.mubr.f32.mxu1 %v3359_v56  ;;  %1602 = vmatprep.mubr.f32.mxu0 %v3320_v36  ;;  %v3366_v36 = vpack.c.bf16 %v3317_v45, %v3316_v46  ;;  %v3374_v46 = vld [vmem:[#allocation50_spill] sm:$0xff]  ;;  %v3375_v45 = vpack.c.bf16 %v3326_v30, %v3325_v19  ;;  %v3383_v30 = vpack.c.bf16 %v3289_v5, %v3288_v25  ;;  %v3390_v25 = vld [vmem:[#allocation73_spill] sm:$0xff] }
  0xcc   :  { %v3382_v19 = vld [vmem:[#allocation62_spill] sm:$0xff]  ;;  %v3391_v5 = vpack.c.bf16 %v2446_v62, %v2444_v57  ;;  %v3399_v57 = vld [vmem:[#allocation80_spill] sm:$0xff] }
  0xcd   :  { %1813 = vmatpush1.bf16.msra.mxu1 %v3360_v20  ;;  %1993 = vmatpush1.bf16.msra.mxu0 %v3361_v24  ;;  %v3400_v62 = vld [vmem:[#allocation84_spill] sm:$0xff] }
  0xce   :  { %1815 = vmatprep.subr.bf16.mxu1 %v3362_v27  ;;  %1995 = vmatprep.subr.bf16.mxu0 %v3363_v34 }
  0xd1   :  { %1817 = vmatpush1.bf16.msra.mxu1 %v3364_v35  ;;  %1997 = vmatpush1.bf16.msra.mxu0 %v3365_v48 }
  0xd2   :  { %1819 = vmatprep.subr.bf16.mxu1 %v3366_v36  ;;  %1999 = vmatprep.subr.bf16.mxu0 %v3367_v49 }
  0xd5   :  { %1821 = vmatpush1.bf16.msra.mxu1 %v3369_v39  ;;  %2001 = vmatpush1.bf16.msra.mxu0 %v3370_v4 }
  0xd6   :  { %1823 = vmatprep.subr.bf16.mxu1 %v3371_v59  ;;  %2003 = vmatprep.subr.bf16.mxu0 %v3372_v6 }
  0xd9   :  { %1825 = vmatpush1.bf16.msra.mxu1 %v3373_v17  ;;  %2005 = vmatpush1.bf16.msra.mxu0 %v3374_v46 }
  0xda   :  { %1827 = vmatprep.subr.bf16.mxu1 %v3375_v45  ;;  %2007 = vmatprep.subr.bf16.mxu0 %v3376_v15 }
  0xdd   :  { %1829 = vmatpush1.bf16.msra.mxu1 %v3377_v42  ;;  %2009 = vmatpush1.bf16.msra.mxu0 %v3378_v1 }
  0xde   :  { %1831 = vmatprep.subr.bf16.mxu1 %v3379_v32  ;;  %2011 = vmatprep.subr.bf16.mxu0 %v3380_v37 }
  0xe1   :  { %1833 = vmatpush1.bf16.msra.mxu1 %v3381_v47  ;;  %2013 = vmatpush1.bf16.msra.mxu0 %v3382_v19 }
  0xe2   :  { %1835 = vmatprep.subr.bf16.mxu1 %v3383_v30  ;;  %2015 = vmatprep.subr.bf16.mxu0 %v3384_v51 }
  0xe5   :  { %1837 = vmatpush1.bf16.msra.mxu1 %v3385_v55  ;;  %2017 = vmatpush1.bf16.msra.mxu0 %v3386_v33 }
  0xe6   :  { %1839 = vmatprep.subr.bf16.mxu1 %v3387_v60  ;;  %2019 = vmatprep.subr.bf16.mxu0 %v3388_v53 }
  0xe9   :  { %1841 = vmatpush1.bf16.msra.mxu1 %v3389_v61  ;;  %2021 = vmatpush1.bf16.msra.mxu0 %v3390_v25 }
  0xea   :  { %1843 = vmatprep.subr.bf16.mxu1 %v3391_v5  ;;  %2023 = vmatprep.subr.bf16.mxu0 %v3392_v22 }
  0xed   :  { %1845 = vmatpush1.bf16.msra.mxu1 %v3393_v7  ;;  %2025 = vmatpush1.bf16.msra.mxu0 %v3394_v2 }
  0xee   :  { %1847 = vmatprep.subr.bf16.mxu1 %v3396_v8  ;;  %2027 = vmatprep.subr.bf16.mxu0 %v3397_v43 }
  0xf1   :  { %1849 = vmatpush1.bf16.msra.mxu1 %v3398_v40  ;;  %2029 = vmatpush1.bf16.msra.mxu0 %v3399_v57 }
  0xf4   :  { %961 = vmatmul.mubr.f32.vlgmr.msra.gmra.mrb[0].mxu1 %v3400_v62  ;;  %1604 = vmatmul.mubr.f32.vlgmr.msra.gmra.mrb[0].mxu0 %v3335_v3  ;;  %v3406_v3 = vld [vmem:[#allocation76_spill] sm:$0xff] }
  0xf5   :  { %968 = vmatprep.mubr.f32.mxu1 %v3401_v26  ;;  %1610 = vmatprep.mubr.f32.mxu0 %v3342_v21  ;;  %v3407_v21 = vld [vmem:[#allocation79_spill] sm:$0xff] }
  0xf8   :  { %971 = vmatmul.mubr.f32.gmra.mrb[2].mxu1 %v3402_v12  ;;  %1612 = vmatmul.mubr.f32.gmra.mrb[2].mxu0 %v2735_v52  ;;  %v3408_v52 = vld [vmem:[#allocation81_spill] sm:$0xff] }
  0xf9   :  { %978 = vmatprep.mubr.f32.mxu1 %v3403_v63  ;;  %1618 = vmatprep.mubr.f32.mxu0 %v2761_v29 }
  0xfc   :  { %981 = vmatmul.mubr.f32.gmra.mrb[4].mxu1 %v3404_v28  ;;  %1620 = vmatmul.mubr.f32.gmra.mrb[4].mxu0 %v2784_v50 }
  0xfd   :  { %988 = vmatprep.mubr.f32.mxu1 %v3405_v9  ;;  %1626 = vmatprep.mubr.f32.mxu0 %v3349_v41 }
 0x100   :  { %991 = vmatmul.mubr.f32.gmra.mrb[6].mxu1 %v3406_v3  ;;  %1628 = vmatmul.mubr.f32.gmra.mrb[6].mxu0 %v3350_v18 }
 0x101   :  { %998 = vmatprep.mubr.f32.mxu1 %v3407_v21  ;;  %1634 = vmatprep.mubr.f32.mxu0 %v2831_v38 }
 0x104   :  { %1001 = vmatmul.mubr.f32.gmra.mrb[8].mxu1 %v3408_v52  ;;  %1636 = vmatmul.mubr.f32.gmra.mrb[8].mxu0 %v2846_v58 }
 0x1c7   :  { %v962_v29 = vpop.f32.mrb[0].mxu1  ;;  %v1605_v0 = vpop.f32.mrb[0].mxu0 }
 0x1c8   :  { %v2030_v54 = vadd.f32 %v1605_v0, %v962_v29  ;;  %v964_v50 = vpop.f32.mrb[1].mxu1  ;;  %v1607_v14 = vpop.f32.mrb[1].mxu0 }
 0x1c9   :  { %v2031_v23 = vadd.f32 %v1607_v14, %v964_v50 }
 0x1ca   :  { %1642 = vst [vmem:[#allocation8] sm:$0xff] %v2030_v54 }
 0x1cb   :  { %1643 = vst [vmem:[#allocation8 + $0x8] sm:$0xff] %v2031_v23  ;;  %v972_v41 = vpop.f32.mrb[2].mxu1  ;;  %v1613_v10 = vpop.f32.mrb[2].mxu0 }
 0x1cc   :  { %v2032_v11 = vadd.f32 %v1613_v10, %v972_v41  ;;  %v974_v18 = vpop.f32.mrb[3].mxu1  ;;  %v1615_v13 = vpop.f32.mrb[3].mxu0 }
 0x1cd   :  { %v2033_v16 = vadd.f32 %v1615_v13, %v974_v18 }
 0x1ce   :  { %1644 = vst [vmem:[#allocation8 + $0x10] sm:$0xff] %v2032_v11 }
 0x1cf   :  { %1645 = vst [vmem:[#allocation8 + $0x18] sm:$0xff] %v2033_v16  ;;  %v982_v38 = vpop.f32.mrb[4].mxu1  ;;  %v1621_v56 = vpop.f32.mrb[4].mxu0 }
 0x1d0   :  { %v2034_v20 = vadd.f32 %v1621_v56, %v982_v38  ;;  %v984_v58 = vpop.f32.mrb[5].mxu1  ;;  %v1623_v24 = vpop.f32.mrb[5].mxu0 }
 0x1d1   :  { %v2035_v27 = vadd.f32 %v1623_v24, %v984_v58 }
 0x1d2   :  { %1646 = vst [vmem:[#allocation8 + $0x20] sm:$0xff] %v2034_v20 }
 0x1d3   :  { %1647 = vst [vmem:[#allocation8 + $0x28] sm:$0xff] %v2035_v27  ;;  %v992_v34 = vpop.f32.mrb[6].mxu1  ;;  %v1629_v35 = vpop.f32.mrb[6].mxu0 }
 0x1d4   :  { %v2036_v48 = vadd.f32 %v1629_v35, %v992_v34  ;;  %v994_v36 = vpop.f32.mrb[7].mxu1  ;;  %v1631_v49 = vpop.f32.mrb[7].mxu0 }
 0x1d5   :  { %v2037_v44 = vadd.f32 %v1631_v49, %v994_v36 }
 0x1d6   :  { %1648 = vst [vmem:[#allocation8 + $0x30] sm:$0xff] %v2036_v48 }
 0x1d7   :  { %1649 = vst [vmem:[#allocation8 + $0x38] sm:$0xff] %v2037_v44  ;;  %v1002_v39 = vpop.f32.mrb[8].mxu1  ;;  %v1637_v4 = vpop.f32.mrb[8].mxu0 }
 0x1d8   :  { %v2038_v59 = vadd.f32 %v1637_v4, %v1002_v39  ;;  %v1004_v6 = vpop.f32.mrb[9].mxu1  ;;  %v1639_v17 = vpop.f32.mrb[9].mxu0 }
 0x1d9   :  { %v2039_v46 = vadd.f32 %v1639_v17, %v1004_v6 }
 0x1da   :  { %1650 = vst [vmem:[#allocation8 + $0x40] sm:$0xff] %v2038_v59 }
 0x1db   :  { %1651 = vst [vmem:[#allocation8 + $0x48] sm:$0xff] %v2039_v46 }
 0x1dc   :  { %2163 = shalt.err (!%p2160_p0)
}
 0x1dd   :  { %s2164_s27 = scalar_lea.hbm %s3075_s3, 1280 }
 0x1de   :  { %p2165_p1 = scmp.ne.s32.totalorder %s3075_s3, %s2164_s27  ;;  %p2168_p2 = scmp.lt.u32.totalorder %s2164_s27, %s3075_s3 }
 0x1e0   :  { %p2170_p3 = pnand %p2168_p2, %p2165_p1 }
 0x1e2   :  { %2173 = shalt.err (!%p2170_p3)
}
 0x1e3   :  { %1663 = dma.vmem_to_hbm [thread:$0]  %s1658_s21, 1280, %s3075_s3, [#allocation4], %s2181_s22, %s2181_s22, %s2182_s23  }
 0x1e4   :  { %2178 = dma.done.wait [#allocation4], 1280  }
 0x1e5   :  { %2179 = vsyncadd [#allocation4], 4294966016 }
 0x1e6   :  { %1667 = vsyncpa [#allocation3], 1 }
 0x1e7   :  { %1668 = vsyncpa [#allocation6], 1 }
 0x1e8   :  { %1669 = vsyncpa [#allocation4], 1 }

</bundles_post_ra>
